<compile_context>
chip_gen: v7x
topology: tpu7x:2x2x1
jax: 0.10.0
libtpu: 0.0.40
codegen_flags: <defaults>
</compile_context>

<pallas_src>
import functools
import math

import jax
import jax.numpy as jnp
from jax.experimental import pallas as pl
from jax.experimental.pallas import tpu as pltpu

PARAM_ORDER = ["wq", "bq", "wk", "bk", "wv", "bv", "wo", "bo",
               "w1", "b1", "w2", "b2", "g1", "be1", "g2", "be2"]
LN_EPS = 1e-5


def _layernorm(x, g, b):
    # one-pass statistics: var = E[x^2] - mu^2 (halves the cross-lane reductions)
    mu = jnp.mean(x, axis=-1, keepdims=True)
    ms = jnp.mean(x * x, axis=-1, keepdims=True)
    var = ms - mu * mu
    return (x - mu) * jax.lax.rsqrt(var + LN_EPS) * g + b


def _encoder_stack_kernel(num_heads,
                          x_ref, pos_ref, bias_ref,
                          wq_ref, bq_ref, wk_ref, bk_ref, wv_ref, bv_ref,
                          wo_ref, bo_ref, w1_ref, b1_ref, w2_ref, b2_ref,
                          g1_ref, be1_ref, g2_ref, be2_ref,
                          out_ref):
    """One grid step = one (batch element, layer)."""
    layer = pl.program_id(1)

    # At the first layer, seed the resident activation block from the input.
    @pl.when(layer == 0)
    def _():
        out_ref[...] = x_ref[...]

    x = out_ref[0]                 # (S, D) f32 — current activation (resident across layers)
    pos = pos_ref[0]               # (S, D) f32
    bias = bias_ref[0]             # (1, S) f32 additive key-padding bias (0 / -1e9)

    S, D = x.shape
    hd = D // num_heads

    # --- self attention (q = k = x + pos, v = x) -------------------------------
    x_bf = x.astype(jnp.bfloat16)
    qk_in = (x + pos).astype(jnp.bfloat16)

    # 1/sqrt(hd) is pre-folded into wq/bq on the host.
    q = (jnp.dot(qk_in, wq_ref[0], preferred_element_type=jnp.float32)
         + bq_ref[0]).astype(jnp.bfloat16)
    k = (jnp.dot(qk_in, wk_ref[0], preferred_element_type=jnp.float32)
         + bk_ref[0]).astype(jnp.bfloat16)
    v = (jnp.dot(x_bf, wv_ref[0], preferred_element_type=jnp.float32)
         + bv_ref[0]).astype(jnp.bfloat16)

    # q @ k^T without materializing a transpose: contract feature dim of both.
    dn_qkt = (((1,), (1,)), ((), ()))

    # Static unroll over heads; each head folds directly into the output projection.
    attn = None
    for h in range(num_heads):
        sl = slice(h * hd, (h + 1) * hd)
        s = jax.lax.dot_general(q[:, sl], k[:, sl], dn_qkt,
                                preferred_element_type=jnp.float32)        # (S, S) f32
        s = s + bias                        # mask stays f32, post f32 accumulation
        s = s - jnp.max(s, axis=-1, keepdims=True)
        p = jnp.exp(s)                      # unnormalized probabilities
        denom = jnp.sum(p, axis=-1, keepdims=True)                         # (S, 1)
        o_h = jnp.dot(p.astype(jnp.bfloat16), v[:, sl],
                      preferred_element_type=jnp.float32)                  # (S, hd)
        # deferred softmax normalization on the small (S, hd) tensor; EUP reciprocal.
        o_h = o_h * pl.reciprocal(denom, approx=True)
        contrib = jnp.dot(o_h.astype(jnp.bfloat16), wo_ref[0, h],
                          preferred_element_type=jnp.float32)              # (S, D)
        attn = contrib if attn is None else attn + contrib
    attn = attn + bo_ref[0]

    # --- residual + LayerNorm 1 ------------------------------------------------
    x1 = _layernorm(x + attn, g1_ref[0], be1_ref[0])

    # --- FFN ---------------------------------------------------------------------
    h1 = jnp.dot(x1.astype(jnp.bfloat16), w1_ref[0],
                 preferred_element_type=jnp.float32) + b1_ref[0]
    h1 = jnp.maximum(h1, 0.0)
    h2 = jnp.dot(h1.astype(jnp.bfloat16), w2_ref[0],
                 preferred_element_type=jnp.float32) + b2_ref[0]

    # --- residual + LayerNorm 2 --------------------------------------------------
    y = _layernorm(x1 + h2, g2_ref[0], be2_ref[0])
    out_ref[0] = y.astype(out_ref.dtype)


def transformer_encoder(src, pos, src_key_padding_mask, params, num_heads):
    """params: list (one dict per layer) of the 16 PARAM_ORDER arrays (f32)."""
    B, S, D = src.shape
    L = len(params)
    hd = D // num_heads
    scale = 1.0 / math.sqrt(hd)

    if src_key_padding_mask is None:
        bias = jnp.zeros((B, 1, S), jnp.float32)
    else:
        bias = jnp.where(src_key_padding_mask, -1e9, 0.0).astype(jnp.float32).reshape(B, 1, S)
    # NOTE: fully-masked rows yield a uniform softmax instead of PyTorch's NaN (benign for DETR).

    # Host-side (free) parameter prep: stack along a leading layer axis so the whole
    # stack runs in one pallas_call, fold the attention scale into wq/bq, pre-split
    # wo per head, and store matmul weights in bf16 (halves weight DMA bytes).
    def stack(name, fn=lambda a: a):
        return jnp.stack([fn(p[name]) for p in params], axis=0)

    bf16 = lambda a: a.astype(jnp.bfloat16)
    wq = stack("wq", lambda a: (a * scale).astype(jnp.bfloat16))        # (L, D, D)  bf16
    bq = stack("bq", lambda a: a * scale)                               # (L, 1, D)  f32
    wk = stack("wk", bf16)
    bk = stack("bk")
    wv = stack("wv", bf16)
    bv = stack("bv")
    wo = stack("wo", lambda a: bf16(a.reshape(num_heads, hd, D)))       # (L, H, hd, D) bf16
    bo = stack("bo")
    w1 = stack("w1", bf16)                                              # (L, D, FF) bf16
    b1 = stack("b1")
    w2 = stack("w2", bf16)                                              # (L, FF, D) bf16
    b2 = stack("b2")
    g1 = stack("g1"); be1 = stack("be1"); g2 = stack("g2"); be2 = stack("be2")

    weights = [wq, bq, wk, bk, wv, bv, wo, bo, w1, b1, w2, b2, g1, be1, g2, be2]

    def _w_spec(arr):
        nd = arr.ndim
        return pl.BlockSpec((1,) + arr.shape[1:],
                            lambda b, l, _nd=nd: (l,) + (0,) * (_nd - 1))

    in_specs = [
        pl.BlockSpec((1, S, D), lambda b, l: (b, 0, 0)),   # src (read only at layer 0)
        pl.BlockSpec((1, S, D), lambda b, l: (b, 0, 0)),   # pos
        pl.BlockSpec((1, 1, S), lambda b, l: (b, 0, 0)),   # key-padding bias
    ] + [_w_spec(a) for a in weights]

    out_spec = pl.BlockSpec((1, S, D), lambda b, l: (b, 0, 0))

    kernel = functools.partial(_encoder_stack_kernel, num_heads)
    # TODO(synk): for real DETR sizes (S ~ 1100, FF = 2048) add a query/row tile over S
    #             as an extra grid axis to bound the (S,S)/(S,FF) f32 intermediates in VMEM.
    return pl.pallas_call(
        kernel,
        out_shape=jax.ShapeDtypeStruct((B, S, D), src.dtype),
        grid=(B, L),
        in_specs=in_specs,
        out_specs=out_spec,
        input_output_aliases={0: 0},    # reuse src's HBM buffer for the output
        compiler_params=pltpu.CompilerParams(
            dimension_semantics=("parallel", "arbitrary"),   # batch // , layers sequential
            vmem_limit_bytes=48 * 1024 * 1024),              # > v5e 16MiB default, < v7x 64MiB phys
    )(src, pos, bias, *weights)


def init_params(key, num_layers, d_model, dim_ff):
    params = []
    for l in range(num_layers):
        lk = jax.random.fold_in(key, l)
        ks = jax.random.split(lk, 8)

        def lin(k, fan_in, fan_out):
            bound = 1.0 / math.sqrt(fan_in)
            kw, kb = jax.random.split(k)
            w = jax.random.uniform(kw, (fan_in, fan_out), jnp.float32, -bound, bound)
            b = jax.random.uniform(kb, (1, fan_out), jnp.float32, -bound, bound)
            return w, b

        wq, bq = lin(ks[0], d_model, d_model)
        wk, bk = lin(ks[1], d_model, d_model)
        wv, bv = lin(ks[2], d_model, d_model)
        wo, bo = lin(ks[3], d_model, d_model)
        w1, b1 = lin(ks[4], d_model, dim_ff)
        w2, b2 = lin(ks[5], dim_ff, d_model)
        params.append({
            "wq": wq, "bq": bq, "wk": wk, "bk": bk, "wv": wv, "bv": bv,
            "wo": wo, "bo": bo, "w1": w1, "b1": b1, "w2": w2, "b2": b2,
            "g1": jnp.ones((1, d_model), jnp.float32),
            "be1": jnp.zeros((1, d_model), jnp.float32),
            "g2": jnp.ones((1, d_model), jnp.float32),
            "be2": jnp.zeros((1, d_model), jnp.float32),
        })
    return params


if __name__ == "__main__":
    # TODO(synk): optional final `norm` of TransformerEncoder is None here (DETR post-norm default).
    B, S, D, H, FF, L = 2, 16, 128, 8, 256, 2
    key = jax.random.PRNGKey(0)
    k_src, k_pos, k_par = jax.random.split(key, 3)

    src = jax.random.normal(k_src, (B, S, D), jnp.float32)
    pos = jax.random.normal(k_pos, (B, S, D), jnp.float32)
    key_padding_mask = jnp.zeros((B, S), dtype=bool)   # no padded keys

    params = init_params(k_par, L, D, FF)
    out = transformer_encoder(src, pos, key_padding_mask, params, H)
    jax.block_until_ready(out)
    assert out.shape == (B, S, D)
    print("KERNEL_OK")
</pallas_src>

<mosaic_0001>
module attributes {stable_mosaic.version = 11 : i64} {
  func.func @_encoder_stack_kernel(%arg0: i32, %arg1: i32, %arg2: memref<1x16x128xf32, #tpu.memory_space<vmem>>, %arg3: memref<1x16x128xf32, #tpu.memory_space<vmem>>, %arg4: memref<1x1x16xf32, #tpu.memory_space<vmem>>, %arg5: memref<1x128x128xbf16, #tpu.memory_space<vmem>>, %arg6: memref<1x1x128xf32, #tpu.memory_space<vmem>>, %arg7: memref<1x128x128xbf16, #tpu.memory_space<vmem>>, %arg8: memref<1x1x128xf32, #tpu.memory_space<vmem>>, %arg9: memref<1x128x128xbf16, #tpu.memory_space<vmem>>, %arg10: memref<1x1x128xf32, #tpu.memory_space<vmem>>, %arg11: memref<1x8x16x128xbf16, #tpu.memory_space<vmem>>, %arg12: memref<1x1x128xf32, #tpu.memory_space<vmem>>, %arg13: memref<1x128x256xbf16, #tpu.memory_space<vmem>>, %arg14: memref<1x1x256xf32, #tpu.memory_space<vmem>>, %arg15: memref<1x256x128xbf16, #tpu.memory_space<vmem>>, %arg16: memref<1x1x128xf32, #tpu.memory_space<vmem>>, %arg17: memref<1x1x128xf32, #tpu.memory_space<vmem>>, %arg18: memref<1x1x128xf32, #tpu.memory_space<vmem>>, %arg19: memref<1x1x128xf32, #tpu.memory_space<vmem>>, %arg20: memref<1x1x128xf32, #tpu.memory_space<vmem>>, %arg21: memref<1x16x128xf32, #tpu.memory_space<vmem>>) attributes {dimension_semantics = [#tpu.dimension_semantics<parallel>, #tpu.dimension_semantics<arbitrary>], iteration_bounds = array<i64: 2, 2>, scalar_prefetch = 0 : i64, scratch_operands = 0 : i64, tpu.core_type = #tpu.core_type<tc>, window_params = [{transform_indices = @transform_0, window_bounds = array<i64: 1, 16, 128>}, {transform_indices = @transform_1, window_bounds = array<i64: 1, 16, 128>}, {transform_indices = @transform_2, window_bounds = array<i64: 1, 1, 16>}, {transform_indices = @transform_3, window_bounds = array<i64: 1, 128, 128>}, {transform_indices = @transform_4, window_bounds = array<i64: 1, 1, 128>}, {transform_indices = @transform_5, window_bounds = array<i64: 1, 128, 128>}, {transform_indices = @transform_6, window_bounds = array<i64: 1, 1, 128>}, {transform_indices = @transform_7, window_bounds = array<i64: 1, 128, 128>}, {transform_indices = @transform_8, window_bounds = array<i64: 1, 1, 128>}, {transform_indices = @transform_9, window_bounds = array<i64: 1, 8, 16, 128>}, {transform_indices = @transform_10, window_bounds = array<i64: 1, 1, 128>}, {transform_indices = @transform_11, window_bounds = array<i64: 1, 128, 256>}, {transform_indices = @transform_12, window_bounds = array<i64: 1, 1, 256>}, {transform_indices = @transform_13, window_bounds = array<i64: 1, 256, 128>}, {transform_indices = @transform_14, window_bounds = array<i64: 1, 1, 128>}, {transform_indices = @transform_15, window_bounds = array<i64: 1, 1, 128>}, {transform_indices = @transform_16, window_bounds = array<i64: 1, 1, 128>}, {transform_indices = @transform_17, window_bounds = array<i64: 1, 1, 128>}, {transform_indices = @transform_18, window_bounds = array<i64: 1, 1, 128>}, {transform_indices = @transform_19, window_bounds = array<i64: 1, 16, 128>}]} {
    %c0_i32 = arith.constant 0 : i32
    %0 = arith.cmpi eq, %arg1, %c0_i32 : i32
    %1 = arith.extui %0 : i1 to i32
    %c0_i32_0 = arith.constant 0 : i32
    %2 = arith.cmpi ne, %1, %c0_i32_0 : i32
    scf.if %2 {
      %c0_137 = arith.constant 0 : index
      %c0_138 = arith.constant 0 : index
      %c0_139 = arith.constant 0 : index
      %298 = vector.load %arg2[%c0_137, %c0_138, %c0_139] : memref<1x16x128xf32, #tpu.memory_space<vmem>>, vector<1x16x128xf32>
      %c0_140 = arith.constant 0 : index
      %c0_141 = arith.constant 0 : index
      %c0_142 = arith.constant 0 : index
      %299 = vector.load %arg21[%c0_140, %c0_141, %c0_142] : memref<1x16x128xf32, #tpu.memory_space<vmem>>, vector<1x16x128xf32>
      tpu.vector_store %arg21[%c0_140, %c0_141, %c0_142], %298 {strides = array<i32>} : memref<1x16x128xf32, #tpu.memory_space<vmem>>, vector<1x16x128xf32>,
    } else {
    }
    %c0 = arith.constant 0 : index
    %c0_1 = arith.constant 0 : index
    %c0_2 = arith.constant 0 : index
    %3 = vector.load %arg21[%c0, %c0_1, %c0_2] : memref<1x16x128xf32, #tpu.memory_space<vmem>>, vector<1x16x128xf32>
    %4 = vector.shape_cast %3 : vector<1x16x128xf32> to vector<16x128xf32>
    %c0_3 = arith.constant 0 : index
    %c0_4 = arith.constant 0 : index
    %c0_5 = arith.constant 0 : index
    %5 = vector.load %arg3[%c0_3, %c0_4, %c0_5] : memref<1x16x128xf32, #tpu.memory_space<vmem>>, vector<1x16x128xf32>
    %6 = vector.shape_cast %5 : vector<1x16x128xf32> to vector<16x128xf32>
    %c0_6 = arith.constant 0 : index
    %c0_7 = arith.constant 0 : index
    %c0_8 = arith.constant 0 : index
    %7 = vector.load %arg4[%c0_6, %c0_7, %c0_8] : memref<1x1x16xf32, #tpu.memory_space<vmem>>, vector<1x1x16xf32>
    %8 = vector.shape_cast %7 : vector<1x1x16xf32> to vector<1x16xf32>
    %9 = arith.truncf %4 : vector<16x128xf32> to vector<16x128xbf16>
    %10 = arith.addf %4, %6 : vector<16x128xf32>
    %11 = arith.truncf %10 : vector<16x128xf32> to vector<16x128xbf16>
    %c0_9 = arith.constant 0 : index
    %c0_10 = arith.constant 0 : index
    %c0_11 = arith.constant 0 : index
    %12 = vector.load %arg5[%c0_9, %c0_10, %c0_11] : memref<1x128x128xbf16, #tpu.memory_space<vmem>>, vector<1x128x128xbf16>
    %13 = vector.shape_cast %12 : vector<1x128x128xbf16> to vector<128x128xbf16>
    %cst = arith.constant dense<0.000000e+00> : vector<16x128xf32>
    %14 = tpu.matmul %11, %13, %cst {dimension_numbers = #tpu.dot_dimension_numbers<[1], [0], [0], [1], [0, 0, 1, 1], [], []>} : vector<16x128xbf16>, vector<128x128xbf16>, vector<16x128xf32> -> vector<16x128xf32>
    %c0_12 = arith.constant 0 : index
    %c0_13 = arith.constant 0 : index
    %c0_14 = arith.constant 0 : index
    %15 = vector.load %arg6[%c0_12, %c0_13, %c0_14] : memref<1x1x128xf32, #tpu.memory_space<vmem>>, vector<1x1x128xf32>
    %16 = vector.shape_cast %15 : vector<1x1x128xf32> to vector<1x128xf32>
    %17 = vector.broadcast %16 : vector<1x128xf32> to vector<16x128xf32>
    %18 = arith.addf %14, %17 : vector<16x128xf32>
    %19 = arith.truncf %18 : vector<16x128xf32> to vector<16x128xbf16>
    %c0_15 = arith.constant 0 : index
    %c0_16 = arith.constant 0 : index
    %c0_17 = arith.constant 0 : index
    %20 = vector.load %arg7[%c0_15, %c0_16, %c0_17] : memref<1x128x128xbf16, #tpu.memory_space<vmem>>, vector<1x128x128xbf16>
    %21 = vector.shape_cast %20 : vector<1x128x128xbf16> to vector<128x128xbf16>
    %cst_18 = arith.constant dense<0.000000e+00> : vector<16x128xf32>
    %22 = tpu.matmul %11, %21, %cst_18 {dimension_numbers = #tpu.dot_dimension_numbers<[1], [0], [0], [1], [0, 0, 1, 1], [], []>} : vector<16x128xbf16>, vector<128x128xbf16>, vector<16x128xf32> -> vector<16x128xf32>
    %c0_19 = arith.constant 0 : index
    %c0_20 = arith.constant 0 : index
    %c0_21 = arith.constant 0 : index
    %23 = vector.load %arg8[%c0_19, %c0_20, %c0_21] : memref<1x1x128xf32, #tpu.memory_space<vmem>>, vector<1x1x128xf32>
    %24 = vector.shape_cast %23 : vector<1x1x128xf32> to vector<1x128xf32>
    %25 = vector.broadcast %24 : vector<1x128xf32> to vector<16x128xf32>
    %26 = arith.addf %22, %25 : vector<16x128xf32>
    %27 = arith.truncf %26 : vector<16x128xf32> to vector<16x128xbf16>
    %c0_22 = arith.constant 0 : index
    %c0_23 = arith.constant 0 : index
    %c0_24 = arith.constant 0 : index
    %28 = vector.load %arg9[%c0_22, %c0_23, %c0_24] : memref<1x128x128xbf16, #tpu.memory_space<vmem>>, vector<1x128x128xbf16>
    %29 = vector.shape_cast %28 : vector<1x128x128xbf16> to vector<128x128xbf16>
    %cst_25 = arith.constant dense<0.000000e+00> : vector<16x128xf32>
    %30 = tpu.matmul %9, %29, %cst_25 {dimension_numbers = #tpu.dot_dimension_numbers<[1], [0], [0], [1], [0, 0, 1, 1], [], []>} : vector<16x128xbf16>, vector<128x128xbf16>, vector<16x128xf32> -> vector<16x128xf32>
    %c0_26 = arith.constant 0 : index
    %c0_27 = arith.constant 0 : index
    %c0_28 = arith.constant 0 : index
    %31 = vector.load %arg10[%c0_26, %c0_27, %c0_28] : memref<1x1x128xf32, #tpu.memory_space<vmem>>, vector<1x1x128xf32>
    %32 = vector.shape_cast %31 : vector<1x1x128xf32> to vector<1x128xf32>
    %33 = vector.broadcast %32 : vector<1x128xf32> to vector<16x128xf32>
    %34 = arith.addf %30, %33 : vector<16x128xf32>
    %35 = arith.truncf %34 : vector<16x128xf32> to vector<16x128xbf16>
    %36 = vector.extract_strided_slice %19 {offsets = [0, 0], sizes = [16, 16], strides = [1, 1]} : vector<16x128xbf16> to vector<16x16xbf16>
    %37 = vector.extract_strided_slice %27 {offsets = [0, 0], sizes = [16, 16], strides = [1, 1]} : vector<16x128xbf16> to vector<16x16xbf16>
    %cst_29 = arith.constant dense<0.000000e+00> : vector<16x16xf32>
    %38 = tpu.matmul %36, %37, %cst_29 {dimension_numbers = #tpu.dot_dimension_numbers<[1], [1], [0], [0], [0, 0, 1, 0], [], []>} : vector<16x16xbf16>, vector<16x16xbf16>, vector<16x16xf32> -> vector<16x16xf32>
    %39 = vector.broadcast %8 : vector<1x16xf32> to vector<16x16xf32>
    %40 = arith.addf %38, %39 : vector<16x16xf32>
    %cst_30 = arith.constant dense<0xFF800000> : vector<16xf32>
    %41 = vector.multi_reduction <maximumf>, %40, %cst_30 [1] : vector<16x16xf32> to vector<16xf32>
    %42 = vector.shape_cast %41 : vector<16xf32> to vector<16x1xf32>
    %43 = vector.broadcast %42 : vector<16x1xf32> to vector<16x16xf32>
    %44 = arith.subf %40, %43 : vector<16x16xf32>
    %45 = math.exp %44 : vector<16x16xf32>
    %cst_31 = arith.constant dense<0.000000e+00> : vector<16xf32>
    %46 = vector.multi_reduction <add>, %45, %cst_31 [1] : vector<16x16xf32> to vector<16xf32>
    %47 = vector.shape_cast %46 : vector<16xf32> to vector<16x1xf32>
    %48 = arith.truncf %45 : vector<16x16xf32> to vector<16x16xbf16>
    %49 = vector.extract_strided_slice %35 {offsets = [0, 0], sizes = [16, 16], strides = [1, 1]} : vector<16x128xbf16> to vector<16x16xbf16>
    %cst_32 = arith.constant dense<0.000000e+00> : vector<16x16xf32>
    %50 = tpu.matmul %48, %49, %cst_32 {dimension_numbers = #tpu.dot_dimension_numbers<[1], [0], [0], [1], [0, 0, 1, 1], [], []>} : vector<16x16xbf16>, vector<16x16xbf16>, vector<16x16xf32> -> vector<16x16xf32>
    %51 = tpu.reciprocal %47 {approx = true} : vector<16x1xf32> -> vector<16x1xf32>
    %52 = vector.broadcast %51 : vector<16x1xf32> to vector<16x16xf32>
    %53 = arith.mulf %50, %52 : vector<16x16xf32>
    %54 = arith.truncf %53 : vector<16x16xf32> to vector<16x16xbf16>
    %c0_33 = arith.constant 0 : index
    %c0_34 = arith.constant 0 : index
    %c0_35 = arith.constant 0 : index
    %c0_36 = arith.constant 0 : index
    %55 = vector.load %arg11[%c0_33, %c0_34, %c0_35, %c0_36] : memref<1x8x16x128xbf16, #tpu.memory_space<vmem>>, vector<1x1x16x128xbf16>
    %56 = vector.shape_cast %55 : vector<1x1x16x128xbf16> to vector<16x128xbf16>
    %cst_37 = arith.constant dense<0.000000e+00> : vector<16x128xf32>
    %57 = tpu.matmul %54, %56, %cst_37 {dimension_numbers = #tpu.dot_dimension_numbers<[1], [0], [0], [1], [0, 0, 1, 1], [], []>} : vector<16x16xbf16>, vector<16x128xbf16>, vector<16x128xf32> -> vector<16x128xf32>
    %58 = vector.extract_strided_slice %19 {offsets = [0, 16], sizes = [16, 16], strides = [1, 1]} : vector<16x128xbf16> to vector<16x16xbf16>
    %59 = vector.extract_strided_slice %27 {offsets = [0, 16], sizes = [16, 16], strides = [1, 1]} : vector<16x128xbf16> to vector<16x16xbf16>
    %cst_38 = arith.constant dense<0.000000e+00> : vector<16x16xf32>
    %60 = tpu.matmul %58, %59, %cst_38 {dimension_numbers = #tpu.dot_dimension_numbers<[1], [1], [0], [0], [0, 0, 1, 0], [], []>} : vector<16x16xbf16>, vector<16x16xbf16>, vector<16x16xf32> -> vector<16x16xf32>
    %61 = vector.broadcast %8 : vector<1x16xf32> to vector<16x16xf32>
    %62 = arith.addf %60, %61 : vector<16x16xf32>
    %cst_39 = arith.constant dense<0xFF800000> : vector<16xf32>
    %63 = vector.multi_reduction <maximumf>, %62, %cst_39 [1] : vector<16x16xf32> to vector<16xf32>
    %64 = vector.shape_cast %63 : vector<16xf32> to vector<16x1xf32>
    %65 = vector.broadcast %64 : vector<16x1xf32> to vector<16x16xf32>
    %66 = arith.subf %62, %65 : vector<16x16xf32>
    %67 = math.exp %66 : vector<16x16xf32>
    %cst_40 = arith.constant dense<0.000000e+00> : vector<16xf32>
    %68 = vector.multi_reduction <add>, %67, %cst_40 [1] : vector<16x16xf32> to vector<16xf32>
    %69 = vector.shape_cast %68 : vector<16xf32> to vector<16x1xf32>
    %70 = arith.truncf %67 : vector<16x16xf32> to vector<16x16xbf16>
    %71 = vector.extract_strided_slice %35 {offsets = [0, 16], sizes = [16, 16], strides = [1, 1]} : vector<16x128xbf16> to vector<16x16xbf16>
    %cst_41 = arith.constant dense<0.000000e+00> : vector<16x16xf32>
    %72 = tpu.matmul %70, %71, %cst_41 {dimension_numbers = #tpu.dot_dimension_numbers<[1], [0], [0], [1], [0, 0, 1, 1], [], []>} : vector<16x16xbf16>, vector<16x16xbf16>, vector<16x16xf32> -> vector<16x16xf32>
    %73 = tpu.reciprocal %69 {approx = true} : vector<16x1xf32> -> vector<16x1xf32>
    %74 = vector.broadcast %73 : vector<16x1xf32> to vector<16x16xf32>
    %75 = arith.mulf %72, %74 : vector<16x16xf32>
    %76 = arith.truncf %75 : vector<16x16xf32> to vector<16x16xbf16>
    %c0_42 = arith.constant 0 : index
    %c1 = arith.constant 1 : index
    %c0_43 = arith.constant 0 : index
    %c0_44 = arith.constant 0 : index
    %77 = vector.load %arg11[%c0_42, %c1, %c0_43, %c0_44] : memref<1x8x16x128xbf16, #tpu.memory_space<vmem>>, vector<1x1x16x128xbf16>
    %78 = vector.shape_cast %77 : vector<1x1x16x128xbf16> to vector<16x128xbf16>
    %cst_45 = arith.constant dense<0.000000e+00> : vector<16x128xf32>
    %79 = tpu.matmul %76, %78, %cst_45 {dimension_numbers = #tpu.dot_dimension_numbers<[1], [0], [0], [1], [0, 0, 1, 1], [], []>} : vector<16x16xbf16>, vector<16x128xbf16>, vector<16x128xf32> -> vector<16x128xf32>
    %80 = arith.addf %57, %79 : vector<16x128xf32>
    %81 = vector.extract_strided_slice %19 {offsets = [0, 32], sizes = [16, 16], strides = [1, 1]} : vector<16x128xbf16> to vector<16x16xbf16>
    %82 = vector.extract_strided_slice %27 {offsets = [0, 32], sizes = [16, 16], strides = [1, 1]} : vector<16x128xbf16> to vector<16x16xbf16>
    %cst_46 = arith.constant dense<0.000000e+00> : vector<16x16xf32>
    %83 = tpu.matmul %81, %82, %cst_46 {dimension_numbers = #tpu.dot_dimension_numbers<[1], [1], [0], [0], [0, 0, 1, 0], [], []>} : vector<16x16xbf16>, vector<16x16xbf16>, vector<16x16xf32> -> vector<16x16xf32>
    %84 = vector.broadcast %8 : vector<1x16xf32> to vector<16x16xf32>
    %85 = arith.addf %83, %84 : vector<16x16xf32>
    %cst_47 = arith.constant dense<0xFF800000> : vector<16xf32>
    %86 = vector.multi_reduction <maximumf>, %85, %cst_47 [1] : vector<16x16xf32> to vector<16xf32>
    %87 = vector.shape_cast %86 : vector<16xf32> to vector<16x1xf32>
    %88 = vector.broadcast %87 : vector<16x1xf32> to vector<16x16xf32>
    %89 = arith.subf %85, %88 : vector<16x16xf32>
    %90 = math.exp %89 : vector<16x16xf32>
    %cst_48 = arith.constant dense<0.000000e+00> : vector<16xf32>
    %91 = vector.multi_reduction <add>, %90, %cst_48 [1] : vector<16x16xf32> to vector<16xf32>
    %92 = vector.shape_cast %91 : vector<16xf32> to vector<16x1xf32>
    %93 = arith.truncf %90 : vector<16x16xf32> to vector<16x16xbf16>
    %94 = vector.extract_strided_slice %35 {offsets = [0, 32], sizes = [16, 16], strides = [1, 1]} : vector<16x128xbf16> to vector<16x16xbf16>
    %cst_49 = arith.constant dense<0.000000e+00> : vector<16x16xf32>
    %95 = tpu.matmul %93, %94, %cst_49 {dimension_numbers = #tpu.dot_dimension_numbers<[1], [0], [0], [1], [0, 0, 1, 1], [], []>} : vector<16x16xbf16>, vector<16x16xbf16>, vector<16x16xf32> -> vector<16x16xf32>
    %96 = tpu.reciprocal %92 {approx = true} : vector<16x1xf32> -> vector<16x1xf32>
    %97 = vector.broadcast %96 : vector<16x1xf32> to vector<16x16xf32>
    %98 = arith.mulf %95, %97 : vector<16x16xf32>
    %99 = arith.truncf %98 : vector<16x16xf32> to vector<16x16xbf16>
    %c0_50 = arith.constant 0 : index
    %c2 = arith.constant 2 : index
    %c0_51 = arith.constant 0 : index
    %c0_52 = arith.constant 0 : index
    %100 = vector.load %arg11[%c0_50, %c2, %c0_51, %c0_52] : memref<1x8x16x128xbf16, #tpu.memory_space<vmem>>, vector<1x1x16x128xbf16>
    %101 = vector.shape_cast %100 : vector<1x1x16x128xbf16> to vector<16x128xbf16>
    %cst_53 = arith.constant dense<0.000000e+00> : vector<16x128xf32>
    %102 = tpu.matmul %99, %101, %cst_53 {dimension_numbers = #tpu.dot_dimension_numbers<[1], [0], [0], [1], [0, 0, 1, 1], [], []>} : vector<16x16xbf16>, vector<16x128xbf16>, vector<16x128xf32> -> vector<16x128xf32>
    %103 = arith.addf %80, %102 : vector<16x128xf32>
    %104 = vector.extract_strided_slice %19 {offsets = [0, 48], sizes = [16, 16], strides = [1, 1]} : vector<16x128xbf16> to vector<16x16xbf16>
    %105 = vector.extract_strided_slice %27 {offsets = [0, 48], sizes = [16, 16], strides = [1, 1]} : vector<16x128xbf16> to vector<16x16xbf16>
    %cst_54 = arith.constant dense<0.000000e+00> : vector<16x16xf32>
    %106 = tpu.matmul %104, %105, %cst_54 {dimension_numbers = #tpu.dot_dimension_numbers<[1], [1], [0], [0], [0, 0, 1, 0], [], []>} : vector<16x16xbf16>, vector<16x16xbf16>, vector<16x16xf32> -> vector<16x16xf32>
    %107 = vector.broadcast %8 : vector<1x16xf32> to vector<16x16xf32>
    %108 = arith.addf %106, %107 : vector<16x16xf32>
    %cst_55 = arith.constant dense<0xFF800000> : vector<16xf32>
    %109 = vector.multi_reduction <maximumf>, %108, %cst_55 [1] : vector<16x16xf32> to vector<16xf32>
    %110 = vector.shape_cast %109 : vector<16xf32> to vector<16x1xf32>
    %111 = vector.broadcast %110 : vector<16x1xf32> to vector<16x16xf32>
    %112 = arith.subf %108, %111 : vector<16x16xf32>
    %113 = math.exp %112 : vector<16x16xf32>
    %cst_56 = arith.constant dense<0.000000e+00> : vector<16xf32>
    %114 = vector.multi_reduction <add>, %113, %cst_56 [1] : vector<16x16xf32> to vector<16xf32>
    %115 = vector.shape_cast %114 : vector<16xf32> to vector<16x1xf32>
    %116 = arith.truncf %113 : vector<16x16xf32> to vector<16x16xbf16>
    %117 = vector.extract_strided_slice %35 {offsets = [0, 48], sizes = [16, 16], strides = [1, 1]} : vector<16x128xbf16> to vector<16x16xbf16>
    %cst_57 = arith.constant dense<0.000000e+00> : vector<16x16xf32>
    %118 = tpu.matmul %116, %117, %cst_57 {dimension_numbers = #tpu.dot_dimension_numbers<[1], [0], [0], [1], [0, 0, 1, 1], [], []>} : vector<16x16xbf16>, vector<16x16xbf16>, vector<16x16xf32> -> vector<16x16xf32>
    %119 = tpu.reciprocal %115 {approx = true} : vector<16x1xf32> -> vector<16x1xf32>
    %120 = vector.broadcast %119 : vector<16x1xf32> to vector<16x16xf32>
    %121 = arith.mulf %118, %120 : vector<16x16xf32>
    %122 = arith.truncf %121 : vector<16x16xf32> to vector<16x16xbf16>
    %c0_58 = arith.constant 0 : index
    %c3 = arith.constant 3 : index
    %c0_59 = arith.constant 0 : index
    %c0_60 = arith.constant 0 : index
    %123 = vector.load %arg11[%c0_58, %c3, %c0_59, %c0_60] : memref<1x8x16x128xbf16, #tpu.memory_space<vmem>>, vector<1x1x16x128xbf16>
    %124 = vector.shape_cast %123 : vector<1x1x16x128xbf16> to vector<16x128xbf16>
    %cst_61 = arith.constant dense<0.000000e+00> : vector<16x128xf32>
    %125 = tpu.matmul %122, %124, %cst_61 {dimension_numbers = #tpu.dot_dimension_numbers<[1], [0], [0], [1], [0, 0, 1, 1], [], []>} : vector<16x16xbf16>, vector<16x128xbf16>, vector<16x128xf32> -> vector<16x128xf32>
    %126 = arith.addf %103, %125 : vector<16x128xf32>
    %127 = vector.extract_strided_slice %19 {offsets = [0, 64], sizes = [16, 16], strides = [1, 1]} : vector<16x128xbf16> to vector<16x16xbf16>
    %128 = vector.extract_strided_slice %27 {offsets = [0, 64], sizes = [16, 16], strides = [1, 1]} : vector<16x128xbf16> to vector<16x16xbf16>
    %cst_62 = arith.constant dense<0.000000e+00> : vector<16x16xf32>
    %129 = tpu.matmul %127, %128, %cst_62 {dimension_numbers = #tpu.dot_dimension_numbers<[1], [1], [0], [0], [0, 0, 1, 0], [], []>} : vector<16x16xbf16>, vector<16x16xbf16>, vector<16x16xf32> -> vector<16x16xf32>
    %130 = vector.broadcast %8 : vector<1x16xf32> to vector<16x16xf32>
    %131 = arith.addf %129, %130 : vector<16x16xf32>
    %cst_63 = arith.constant dense<0xFF800000> : vector<16xf32>
    %132 = vector.multi_reduction <maximumf>, %131, %cst_63 [1] : vector<16x16xf32> to vector<16xf32>
    %133 = vector.shape_cast %132 : vector<16xf32> to vector<16x1xf32>
    %134 = vector.broadcast %133 : vector<16x1xf32> to vector<16x16xf32>
    %135 = arith.subf %131, %134 : vector<16x16xf32>
    %136 = math.exp %135 : vector<16x16xf32>
    %cst_64 = arith.constant dense<0.000000e+00> : vector<16xf32>
    %137 = vector.multi_reduction <add>, %136, %cst_64 [1] : vector<16x16xf32> to vector<16xf32>
    %138 = vector.shape_cast %137 : vector<16xf32> to vector<16x1xf32>
    %139 = arith.truncf %136 : vector<16x16xf32> to vector<16x16xbf16>
    %140 = vector.extract_strided_slice %35 {offsets = [0, 64], sizes = [16, 16], strides = [1, 1]} : vector<16x128xbf16> to vector<16x16xbf16>
    %cst_65 = arith.constant dense<0.000000e+00> : vector<16x16xf32>
    %141 = tpu.matmul %139, %140, %cst_65 {dimension_numbers = #tpu.dot_dimension_numbers<[1], [0], [0], [1], [0, 0, 1, 1], [], []>} : vector<16x16xbf16>, vector<16x16xbf16>, vector<16x16xf32> -> vector<16x16xf32>
    %142 = tpu.reciprocal %138 {approx = true} : vector<16x1xf32> -> vector<16x1xf32>
    %143 = vector.broadcast %142 : vector<16x1xf32> to vector<16x16xf32>
    %144 = arith.mulf %141, %143 : vector<16x16xf32>
    %145 = arith.truncf %144 : vector<16x16xf32> to vector<16x16xbf16>
    %c0_66 = arith.constant 0 : index
    %c4 = arith.constant 4 : index
    %c0_67 = arith.constant 0 : index
    %c0_68 = arith.constant 0 : index
    %146 = vector.load %arg11[%c0_66, %c4, %c0_67, %c0_68] : memref<1x8x16x128xbf16, #tpu.memory_space<vmem>>, vector<1x1x16x128xbf16>
    %147 = vector.shape_cast %146 : vector<1x1x16x128xbf16> to vector<16x128xbf16>
    %cst_69 = arith.constant dense<0.000000e+00> : vector<16x128xf32>
    %148 = tpu.matmul %145, %147, %cst_69 {dimension_numbers = #tpu.dot_dimension_numbers<[1], [0], [0], [1], [0, 0, 1, 1], [], []>} : vector<16x16xbf16>, vector<16x128xbf16>, vector<16x128xf32> -> vector<16x128xf32>
    %149 = arith.addf %126, %148 : vector<16x128xf32>
    %150 = vector.extract_strided_slice %19 {offsets = [0, 80], sizes = [16, 16], strides = [1, 1]} : vector<16x128xbf16> to vector<16x16xbf16>
    %151 = vector.extract_strided_slice %27 {offsets = [0, 80], sizes = [16, 16], strides = [1, 1]} : vector<16x128xbf16> to vector<16x16xbf16>
    %cst_70 = arith.constant dense<0.000000e+00> : vector<16x16xf32>
    %152 = tpu.matmul %150, %151, %cst_70 {dimension_numbers = #tpu.dot_dimension_numbers<[1], [1], [0], [0], [0, 0, 1, 0], [], []>} : vector<16x16xbf16>, vector<16x16xbf16>, vector<16x16xf32> -> vector<16x16xf32>
    %153 = vector.broadcast %8 : vector<1x16xf32> to vector<16x16xf32>
    %154 = arith.addf %152, %153 : vector<16x16xf32>
    %cst_71 = arith.constant dense<0xFF800000> : vector<16xf32>
    %155 = vector.multi_reduction <maximumf>, %154, %cst_71 [1] : vector<16x16xf32> to vector<16xf32>
    %156 = vector.shape_cast %155 : vector<16xf32> to vector<16x1xf32>
    %157 = vector.broadcast %156 : vector<16x1xf32> to vector<16x16xf32>
    %158 = arith.subf %154, %157 : vector<16x16xf32>
    %159 = math.exp %158 : vector<16x16xf32>
    %cst_72 = arith.constant dense<0.000000e+00> : vector<16xf32>
    %160 = vector.multi_reduction <add>, %159, %cst_72 [1] : vector<16x16xf32> to vector<16xf32>
    %161 = vector.shape_cast %160 : vector<16xf32> to vector<16x1xf32>
    %162 = arith.truncf %159 : vector<16x16xf32> to vector<16x16xbf16>
    %163 = vector.extract_strided_slice %35 {offsets = [0, 80], sizes = [16, 16], strides = [1, 1]} : vector<16x128xbf16> to vector<16x16xbf16>
    %cst_73 = arith.constant dense<0.000000e+00> : vector<16x16xf32>
    %164 = tpu.matmul %162, %163, %cst_73 {dimension_numbers = #tpu.dot_dimension_numbers<[1], [0], [0], [1], [0, 0, 1, 1], [], []>} : vector<16x16xbf16>, vector<16x16xbf16>, vector<16x16xf32> -> vector<16x16xf32>
    %165 = tpu.reciprocal %161 {approx = true} : vector<16x1xf32> -> vector<16x1xf32>
    %166 = vector.broadcast %165 : vector<16x1xf32> to vector<16x16xf32>
    %167 = arith.mulf %164, %166 : vector<16x16xf32>
    %168 = arith.truncf %167 : vector<16x16xf32> to vector<16x16xbf16>
    %c0_74 = arith.constant 0 : index
    %c5 = arith.constant 5 : index
    %c0_75 = arith.constant 0 : index
    %c0_76 = arith.constant 0 : index
    %169 = vector.load %arg11[%c0_74, %c5, %c0_75, %c0_76] : memref<1x8x16x128xbf16, #tpu.memory_space<vmem>>, vector<1x1x16x128xbf16>
    %170 = vector.shape_cast %169 : vector<1x1x16x128xbf16> to vector<16x128xbf16>
    %cst_77 = arith.constant dense<0.000000e+00> : vector<16x128xf32>
    %171 = tpu.matmul %168, %170, %cst_77 {dimension_numbers = #tpu.dot_dimension_numbers<[1], [0], [0], [1], [0, 0, 1, 1], [], []>} : vector<16x16xbf16>, vector<16x128xbf16>, vector<16x128xf32> -> vector<16x128xf32>
    %172 = arith.addf %149, %171 : vector<16x128xf32>
    %173 = vector.extract_strided_slice %19 {offsets = [0, 96], sizes = [16, 16], strides = [1, 1]} : vector<16x128xbf16> to vector<16x16xbf16>
    %174 = vector.extract_strided_slice %27 {offsets = [0, 96], sizes = [16, 16], strides = [1, 1]} : vector<16x128xbf16> to vector<16x16xbf16>
    %cst_78 = arith.constant dense<0.000000e+00> : vector<16x16xf32>
    %175 = tpu.matmul %173, %174, %cst_78 {dimension_numbers = #tpu.dot_dimension_numbers<[1], [1], [0], [0], [0, 0, 1, 0], [], []>} : vector<16x16xbf16>, vector<16x16xbf16>, vector<16x16xf32> -> vector<16x16xf32>
    %176 = vector.broadcast %8 : vector<1x16xf32> to vector<16x16xf32>
    %177 = arith.addf %175, %176 : vector<16x16xf32>
    %cst_79 = arith.constant dense<0xFF800000> : vector<16xf32>
    %178 = vector.multi_reduction <maximumf>, %177, %cst_79 [1] : vector<16x16xf32> to vector<16xf32>
    %179 = vector.shape_cast %178 : vector<16xf32> to vector<16x1xf32>
    %180 = vector.broadcast %179 : vector<16x1xf32> to vector<16x16xf32>
    %181 = arith.subf %177, %180 : vector<16x16xf32>
    %182 = math.exp %181 : vector<16x16xf32>
    %cst_80 = arith.constant dense<0.000000e+00> : vector<16xf32>
    %183 = vector.multi_reduction <add>, %182, %cst_80 [1] : vector<16x16xf32> to vector<16xf32>
    %184 = vector.shape_cast %183 : vector<16xf32> to vector<16x1xf32>
    %185 = arith.truncf %182 : vector<16x16xf32> to vector<16x16xbf16>
    %186 = vector.extract_strided_slice %35 {offsets = [0, 96], sizes = [16, 16], strides = [1, 1]} : vector<16x128xbf16> to vector<16x16xbf16>
    %cst_81 = arith.constant dense<0.000000e+00> : vector<16x16xf32>
    %187 = tpu.matmul %185, %186, %cst_81 {dimension_numbers = #tpu.dot_dimension_numbers<[1], [0], [0], [1], [0, 0, 1, 1], [], []>} : vector<16x16xbf16>, vector<16x16xbf16>, vector<16x16xf32> -> vector<16x16xf32>
    %188 = tpu.reciprocal %184 {approx = true} : vector<16x1xf32> -> vector<16x1xf32>
    %189 = vector.broadcast %188 : vector<16x1xf32> to vector<16x16xf32>
    %190 = arith.mulf %187, %189 : vector<16x16xf32>
    %191 = arith.truncf %190 : vector<16x16xf32> to vector<16x16xbf16>
    %c0_82 = arith.constant 0 : index
    %c6 = arith.constant 6 : index
    %c0_83 = arith.constant 0 : index
    %c0_84 = arith.constant 0 : index
    %192 = vector.load %arg11[%c0_82, %c6, %c0_83, %c0_84] : memref<1x8x16x128xbf16, #tpu.memory_space<vmem>>, vector<1x1x16x128xbf16>
    %193 = vector.shape_cast %192 : vector<1x1x16x128xbf16> to vector<16x128xbf16>
    %cst_85 = arith.constant dense<0.000000e+00> : vector<16x128xf32>
    %194 = tpu.matmul %191, %193, %cst_85 {dimension_numbers = #tpu.dot_dimension_numbers<[1], [0], [0], [1], [0, 0, 1, 1], [], []>} : vector<16x16xbf16>, vector<16x128xbf16>, vector<16x128xf32> -> vector<16x128xf32>
    %195 = arith.addf %172, %194 : vector<16x128xf32>
    %196 = vector.extract_strided_slice %19 {offsets = [0, 112], sizes = [16, 16], strides = [1, 1]} : vector<16x128xbf16> to vector<16x16xbf16>
    %197 = vector.extract_strided_slice %27 {offsets = [0, 112], sizes = [16, 16], strides = [1, 1]} : vector<16x128xbf16> to vector<16x16xbf16>
    %cst_86 = arith.constant dense<0.000000e+00> : vector<16x16xf32>
    %198 = tpu.matmul %196, %197, %cst_86 {dimension_numbers = #tpu.dot_dimension_numbers<[1], [1], [0], [0], [0, 0, 1, 0], [], []>} : vector<16x16xbf16>, vector<16x16xbf16>, vector<16x16xf32> -> vector<16x16xf32>
    %199 = vector.broadcast %8 : vector<1x16xf32> to vector<16x16xf32>
    %200 = arith.addf %198, %199 : vector<16x16xf32>
    %cst_87 = arith.constant dense<0xFF800000> : vector<16xf32>
    %201 = vector.multi_reduction <maximumf>, %200, %cst_87 [1] : vector<16x16xf32> to vector<16xf32>
    %202 = vector.shape_cast %201 : vector<16xf32> to vector<16x1xf32>
    %203 = vector.broadcast %202 : vector<16x1xf32> to vector<16x16xf32>
    %204 = arith.subf %200, %203 : vector<16x16xf32>
    %205 = math.exp %204 : vector<16x16xf32>
    %cst_88 = arith.constant dense<0.000000e+00> : vector<16xf32>
    %206 = vector.multi_reduction <add>, %205, %cst_88 [1] : vector<16x16xf32> to vector<16xf32>
    %207 = vector.shape_cast %206 : vector<16xf32> to vector<16x1xf32>
    %208 = arith.truncf %205 : vector<16x16xf32> to vector<16x16xbf16>
    %209 = vector.extract_strided_slice %35 {offsets = [0, 112], sizes = [16, 16], strides = [1, 1]} : vector<16x128xbf16> to vector<16x16xbf16>
    %cst_89 = arith.constant dense<0.000000e+00> : vector<16x16xf32>
    %210 = tpu.matmul %208, %209, %cst_89 {dimension_numbers = #tpu.dot_dimension_numbers<[1], [0], [0], [1], [0, 0, 1, 1], [], []>} : vector<16x16xbf16>, vector<16x16xbf16>, vector<16x16xf32> -> vector<16x16xf32>
    %211 = tpu.reciprocal %207 {approx = true} : vector<16x1xf32> -> vector<16x1xf32>
    %212 = vector.broadcast %211 : vector<16x1xf32> to vector<16x16xf32>
    %213 = arith.mulf %210, %212 : vector<16x16xf32>
    %214 = arith.truncf %213 : vector<16x16xf32> to vector<16x16xbf16>
    %c0_90 = arith.constant 0 : index
    %c7 = arith.constant 7 : index
    %c0_91 = arith.constant 0 : index
    %c0_92 = arith.constant 0 : index
    %215 = vector.load %arg11[%c0_90, %c7, %c0_91, %c0_92] : memref<1x8x16x128xbf16, #tpu.memory_space<vmem>>, vector<1x1x16x128xbf16>
    %216 = vector.shape_cast %215 : vector<1x1x16x128xbf16> to vector<16x128xbf16>
    %cst_93 = arith.constant dense<0.000000e+00> : vector<16x128xf32>
    %217 = tpu.matmul %214, %216, %cst_93 {dimension_numbers = #tpu.dot_dimension_numbers<[1], [0], [0], [1], [0, 0, 1, 1], [], []>} : vector<16x16xbf16>, vector<16x128xbf16>, vector<16x128xf32> -> vector<16x128xf32>
    %218 = arith.addf %195, %217 : vector<16x128xf32>
    %c0_94 = arith.constant 0 : index
    %c0_95 = arith.constant 0 : index
    %c0_96 = arith.constant 0 : index
    %219 = vector.load %arg12[%c0_94, %c0_95, %c0_96] : memref<1x1x128xf32, #tpu.memory_space<vmem>>, vector<1x1x128xf32>
    %220 = vector.shape_cast %219 : vector<1x1x128xf32> to vector<1x128xf32>
    %221 = vector.broadcast %220 : vector<1x128xf32> to vector<16x128xf32>
    %222 = arith.addf %218, %221 : vector<16x128xf32>
    %223 = arith.addf %4, %222 : vector<16x128xf32>
    %c0_97 = arith.constant 0 : index
    %c0_98 = arith.constant 0 : index
    %c0_99 = arith.constant 0 : index
    %224 = vector.load %arg17[%c0_97, %c0_98, %c0_99] : memref<1x1x128xf32, #tpu.memory_space<vmem>>, vector<1x1x128xf32>
    %225 = vector.shape_cast %224 : vector<1x1x128xf32> to vector<1x128xf32>
    %c0_100 = arith.constant 0 : index
    %c0_101 = arith.constant 0 : index
    %c0_102 = arith.constant 0 : index
    %226 = vector.load %arg18[%c0_100, %c0_101, %c0_102] : memref<1x1x128xf32, #tpu.memory_space<vmem>>, vector<1x1x128xf32>
    %227 = vector.shape_cast %226 : vector<1x1x128xf32> to vector<1x128xf32>
    %cst_103 = arith.constant dense<0.000000e+00> : vector<16xf32>
    %228 = vector.multi_reduction <add>, %223, %cst_103 [1] : vector<16x128xf32> to vector<16xf32>
    %229 = vector.shape_cast %228 : vector<16xf32> to vector<16x1xf32>
    %cst_104 = arith.constant 1.280000e+02 : f32
    %230 = vector.broadcast %cst_104 : f32 to vector<16x1xf32>
    %231 = arith.divf %229, %230 : vector<16x1xf32>
    %232 = arith.mulf %223, %223 : vector<16x128xf32>
    %cst_105 = arith.constant dense<0.000000e+00> : vector<16xf32>
    %233 = vector.multi_reduction <add>, %232, %cst_105 [1] : vector<16x128xf32> to vector<16xf32>
    %234 = vector.shape_cast %233 : vector<16xf32> to vector<16x1xf32>
    %cst_106 = arith.constant 1.280000e+02 : f32
    %235 = vector.broadcast %cst_106 : f32 to vector<16x1xf32>
    %236 = arith.divf %234, %235 : vector<16x1xf32>
    %237 = arith.mulf %231, %231 : vector<16x1xf32>
    %238 = arith.subf %236, %237 : vector<16x1xf32>
    %239 = vector.broadcast %231 : vector<16x1xf32> to vector<16x128xf32>
    %240 = arith.subf %223, %239 : vector<16x128xf32>
    %cst_107 = arith.constant 9.99999974E-6 : f32
    %241 = vector.broadcast %cst_107 : f32 to vector<16x1xf32>
    %242 = arith.addf %238, %241 : vector<16x1xf32>
    %243 = math.rsqrt %242 : vector<16x1xf32>
    %244 = vector.broadcast %243 : vector<16x1xf32> to vector<16x128xf32>
    %245 = arith.mulf %240, %244 : vector<16x128xf32>
    %246 = vector.broadcast %225 : vector<1x128xf32> to vector<16x128xf32>
    %247 = arith.mulf %245, %246 : vector<16x128xf32>
    %248 = vector.broadcast %227 : vector<1x128xf32> to vector<16x128xf32>
    %249 = arith.addf %247, %248 : vector<16x128xf32>
    %250 = arith.truncf %249 : vector<16x128xf32> to vector<16x128xbf16>
    %c0_108 = arith.constant 0 : index
    %c0_109 = arith.constant 0 : index
    %c0_110 = arith.constant 0 : index
    %251 = vector.load %arg13[%c0_108, %c0_109, %c0_110] : memref<1x128x256xbf16, #tpu.memory_space<vmem>>, vector<1x128x256xbf16>
    %252 = vector.shape_cast %251 : vector<1x128x256xbf16> to vector<128x256xbf16>
    %cst_111 = arith.constant dense<0.000000e+00> : vector<16x256xf32>
    %253 = tpu.matmul %250, %252, %cst_111 {dimension_numbers = #tpu.dot_dimension_numbers<[1], [0], [0], [1], [0, 0, 1, 1], [], []>} : vector<16x128xbf16>, vector<128x256xbf16>, vector<16x256xf32> -> vector<16x256xf32>
    %c0_112 = arith.constant 0 : index
    %c0_113 = arith.constant 0 : index
    %c0_114 = arith.constant 0 : index
    %254 = vector.load %arg14[%c0_112, %c0_113, %c0_114] : memref<1x1x256xf32, #tpu.memory_space<vmem>>, vector<1x1x256xf32>
    %255 = vector.shape_cast %254 : vector<1x1x256xf32> to vector<1x256xf32>
    %256 = vector.broadcast %255 : vector<1x256xf32> to vector<16x256xf32>
    %257 = arith.addf %253, %256 : vector<16x256xf32>
    %cst_115 = arith.constant 0.000000e+00 : f32
    %258 = vector.broadcast %cst_115 : f32 to vector<16x256xf32>
    %259 = arith.maximumf %257, %258 : vector<16x256xf32>
    %260 = arith.truncf %259 : vector<16x256xf32> to vector<16x256xbf16>
    %c0_116 = arith.constant 0 : index
    %c0_117 = arith.constant 0 : index
    %c0_118 = arith.constant 0 : index
    %261 = vector.load %arg15[%c0_116, %c0_117, %c0_118] : memref<1x256x128xbf16, #tpu.memory_space<vmem>>, vector<1x256x128xbf16>
    %262 = vector.shape_cast %261 : vector<1x256x128xbf16> to vector<256x128xbf16>
    %cst_119 = arith.constant dense<0.000000e+00> : vector<16x128xf32>
    %263 = tpu.matmul %260, %262, %cst_119 {dimension_numbers = #tpu.dot_dimension_numbers<[1], [0], [0], [1], [0, 0, 1, 1], [], []>} : vector<16x256xbf16>, vector<256x128xbf16>, vector<16x128xf32> -> vector<16x128xf32>
    %c0_120 = arith.constant 0 : index
    %c0_121 = arith.constant 0 : index
    %c0_122 = arith.constant 0 : index
    %264 = vector.load %arg16[%c0_120, %c0_121, %c0_122] : memref<1x1x128xf32, #tpu.memory_space<vmem>>, vector<1x1x128xf32>
    %265 = vector.shape_cast %264 : vector<1x1x128xf32> to vector<1x128xf32>
    %266 = vector.broadcast %265 : vector<1x128xf32> to vector<16x128xf32>
    %267 = arith.addf %263, %266 : vector<16x128xf32>
    %268 = arith.addf %249, %267 : vector<16x128xf32>
    %c0_123 = arith.constant 0 : index
    %c0_124 = arith.constant 0 : index
    %c0_125 = arith.constant 0 : index
    %269 = vector.load %arg19[%c0_123, %c0_124, %c0_125] : memref<1x1x128xf32, #tpu.memory_space<vmem>>, vector<1x1x128xf32>
    %270 = vector.shape_cast %269 : vector<1x1x128xf32> to vector<1x128xf32>
    %c0_126 = arith.constant 0 : index
    %c0_127 = arith.constant 0 : index
    %c0_128 = arith.constant 0 : index
    %271 = vector.load %arg20[%c0_126, %c0_127, %c0_128] : memref<1x1x128xf32, #tpu.memory_space<vmem>>, vector<1x1x128xf32>
    %272 = vector.shape_cast %271 : vector<1x1x128xf32> to vector<1x128xf32>
    %cst_129 = arith.constant dense<0.000000e+00> : vector<16xf32>
    %273 = vector.multi_reduction <add>, %268, %cst_129 [1] : vector<16x128xf32> to vector<16xf32>
    %274 = vector.shape_cast %273 : vector<16xf32> to vector<16x1xf32>
    %cst_130 = arith.constant 1.280000e+02 : f32
    %275 = vector.broadcast %cst_130 : f32 to vector<16x1xf32>
    %276 = arith.divf %274, %275 : vector<16x1xf32>
    %277 = arith.mulf %268, %268 : vector<16x128xf32>
    %cst_131 = arith.constant dense<0.000000e+00> : vector<16xf32>
    %278 = vector.multi_reduction <add>, %277, %cst_131 [1] : vector<16x128xf32> to vector<16xf32>
    %279 = vector.shape_cast %278 : vector<16xf32> to vector<16x1xf32>
    %cst_132 = arith.constant 1.280000e+02 : f32
    %280 = vector.broadcast %cst_132 : f32 to vector<16x1xf32>
    %281 = arith.divf %279, %280 : vector<16x1xf32>
    %282 = arith.mulf %276, %276 : vector<16x1xf32>
    %283 = arith.subf %281, %282 : vector<16x1xf32>
    %284 = vector.broadcast %276 : vector<16x1xf32> to vector<16x128xf32>
    %285 = arith.subf %268, %284 : vector<16x128xf32>
    %cst_133 = arith.constant 9.99999974E-6 : f32
    %286 = vector.broadcast %cst_133 : f32 to vector<16x1xf32>
    %287 = arith.addf %283, %286 : vector<16x1xf32>
    %288 = math.rsqrt %287 : vector<16x1xf32>
    %289 = vector.broadcast %288 : vector<16x1xf32> to vector<16x128xf32>
    %290 = arith.mulf %285, %289 : vector<16x128xf32>
    %291 = vector.broadcast %270 : vector<1x128xf32> to vector<16x128xf32>
    %292 = arith.mulf %290, %291 : vector<16x128xf32>
    %293 = vector.broadcast %272 : vector<1x128xf32> to vector<16x128xf32>
    %294 = arith.addf %292, %293 : vector<16x128xf32>
    %c0_134 = arith.constant 0 : index
    %c0_135 = arith.constant 0 : index
    %c0_136 = arith.constant 0 : index
    %295 = vector.load %arg21[%c0_134, %c0_135, %c0_136] : memref<1x16x128xf32, #tpu.memory_space<vmem>>, vector<1x16x128xf32>
    %296 = vector.shape_cast %295 : vector<1x16x128xf32> to vector<16x128xf32>
    %297 = vector.shape_cast %294 : vector<16x128xf32> to vector<1x16x128xf32>
    tpu.vector_store %arg21[%c0_134, %c0_135, %c0_136], %297 {strides = array<i32>} : memref<1x16x128xf32, #tpu.memory_space<vmem>>, vector<1x16x128xf32>,
    return
  }
  func.func @transform_0(%arg0: i32, %arg1: i32) -> (i32, i32, i32) {
    %c0_i32 = arith.constant 0 : i32
    %c0_i32_0 = arith.constant 0 : i32
    %c0_i32_1 = arith.constant 0 : i32
    return %arg0, %c0_i32, %c0_i32_0 : i32, i32, i32
  }
  func.func @transform_1(%arg0: i32, %arg1: i32) -> (i32, i32, i32) {
    %c0_i32 = arith.constant 0 : i32
    %c0_i32_0 = arith.constant 0 : i32
    %c0_i32_1 = arith.constant 0 : i32
    return %arg0, %c0_i32, %c0_i32_0 : i32, i32, i32
  }
  func.func @transform_2(%arg0: i32, %arg1: i32) -> (i32, i32, i32) {
    %c0_i32 = arith.constant 0 : i32
    %c0_i32_0 = arith.constant 0 : i32
    %c0_i32_1 = arith.constant 0 : i32
    return %arg0, %c0_i32, %c0_i32_0 : i32, i32, i32
  }
  func.func @transform_3(%arg0: i32, %arg1: i32) -> (i32, i32, i32) {
    %c0_i32 = arith.constant 0 : i32
    %c0_i32_0 = arith.constant 0 : i32
    %c0_i32_1 = arith.constant 0 : i32
    return %arg1, %c0_i32, %c0_i32_0 : i32, i32, i32
  }
  func.func @transform_4(%arg0: i32, %arg1: i32) -> (i32, i32, i32) {
    %c0_i32 = arith.constant 0 : i32
    %c0_i32_0 = arith.constant 0 : i32
    %c0_i32_1 = arith.constant 0 : i32
    return %arg1, %c0_i32, %c0_i32_0 : i32, i32, i32
  }
  func.func @transform_5(%arg0: i32, %arg1: i32) -> (i32, i32, i32) {
    %c0_i32 = arith.constant 0 : i32
    %c0_i32_0 = arith.constant 0 : i32
    %c0_i32_1 = arith.constant 0 : i32
    return %arg1, %c0_i32, %c0_i32_0 : i32, i32, i32
  }
  func.func @transform_6(%arg0: i32, %arg1: i32) -> (i32, i32, i32) {
    %c0_i32 = arith.constant 0 : i32
    %c0_i32_0 = arith.constant 0 : i32
    %c0_i32_1 = arith.constant 0 : i32
    return %arg1, %c0_i32, %c0_i32_0 : i32, i32, i32
  }
  func.func @transform_7(%arg0: i32, %arg1: i32) -> (i32, i32, i32) {
    %c0_i32 = arith.constant 0 : i32
    %c0_i32_0 = arith.constant 0 : i32
    %c0_i32_1 = arith.constant 0 : i32
    return %arg1, %c0_i32, %c0_i32_0 : i32, i32, i32
  }
  func.func @transform_8(%arg0: i32, %arg1: i32) -> (i32, i32, i32) {
    %c0_i32 = arith.constant 0 : i32
    %c0_i32_0 = arith.constant 0 : i32
    %c0_i32_1 = arith.constant 0 : i32
    return %arg1, %c0_i32, %c0_i32_0 : i32, i32, i32
  }
  func.func @transform_9(%arg0: i32, %arg1: i32) -> (i32, i32, i32, i32) {
    %c0_i32 = arith.constant 0 : i32
    %c0_i32_0 = arith.constant 0 : i32
    %c0_i32_1 = arith.constant 0 : i32
    %c0_i32_2 = arith.constant 0 : i32
    return %arg1, %c0_i32, %c0_i32_0, %c0_i32_1 : i32, i32, i32, i32
  }
  func.func @transform_10(%arg0: i32, %arg1: i32) -> (i32, i32, i32) {
    %c0_i32 = arith.constant 0 : i32
    %c0_i32_0 = arith.constant 0 : i32
    %c0_i32_1 = arith.constant 0 : i32
    return %arg1, %c0_i32, %c0_i32_0 : i32, i32, i32
  }
  func.func @transform_11(%arg0: i32, %arg1: i32) -> (i32, i32, i32) {
    %c0_i32 = arith.constant 0 : i32
    %c0_i32_0 = arith.constant 0 : i32
    %c0_i32_1 = arith.constant 0 : i32
    return %arg1, %c0_i32, %c0_i32_0 : i32, i32, i32
  }
  func.func @transform_12(%arg0: i32, %arg1: i32) -> (i32, i32, i32) {
    %c0_i32 = arith.constant 0 : i32
    %c0_i32_0 = arith.constant 0 : i32
    %c0_i32_1 = arith.constant 0 : i32
    return %arg1, %c0_i32, %c0_i32_0 : i32, i32, i32
  }
  func.func @transform_13(%arg0: i32, %arg1: i32) -> (i32, i32, i32) {
    %c0_i32 = arith.constant 0 : i32
    %c0_i32_0 = arith.constant 0 : i32
    %c0_i32_1 = arith.constant 0 : i32
    return %arg1, %c0_i32, %c0_i32_0 : i32, i32, i32
  }
  func.func @transform_14(%arg0: i32, %arg1: i32) -> (i32, i32, i32) {
    %c0_i32 = arith.constant 0 : i32
    %c0_i32_0 = arith.constant 0 : i32
    %c0_i32_1 = arith.constant 0 : i32
    return %arg1, %c0_i32, %c0_i32_0 : i32, i32, i32
  }
  func.func @transform_15(%arg0: i32, %arg1: i32) -> (i32, i32, i32) {
    %c0_i32 = arith.constant 0 : i32
    %c0_i32_0 = arith.constant 0 : i32
    %c0_i32_1 = arith.constant 0 : i32
    return %arg1, %c0_i32, %c0_i32_0 : i32, i32, i32
  }
  func.func @transform_16(%arg0: i32, %arg1: i32) -> (i32, i32, i32) {
    %c0_i32 = arith.constant 0 : i32
    %c0_i32_0 = arith.constant 0 : i32
    %c0_i32_1 = arith.constant 0 : i32
    return %arg1, %c0_i32, %c0_i32_0 : i32, i32, i32
  }
  func.func @transform_17(%arg0: i32, %arg1: i32) -> (i32, i32, i32) {
    %c0_i32 = arith.constant 0 : i32
    %c0_i32_0 = arith.constant 0 : i32
    %c0_i32_1 = arith.constant 0 : i32
    return %arg1, %c0_i32, %c0_i32_0 : i32, i32, i32
  }
  func.func @transform_18(%arg0: i32, %arg1: i32) -> (i32, i32, i32) {
    %c0_i32 = arith.constant 0 : i32
    %c0_i32_0 = arith.constant 0 : i32
    %c0_i32_1 = arith.constant 0 : i32
    return %arg1, %c0_i32, %c0_i32_0 : i32, i32, i32
  }
  func.func @transform_19(%arg0: i32, %arg1: i32) -> (i32, i32, i32) {
    %c0_i32 = arith.constant 0 : i32
    %c0_i32_0 = arith.constant 0 : i32
    %c0_i32_1 = arith.constant 0 : i32
    return %arg0, %c0_i32, %c0_i32_0 : i32, i32, i32
  }
}

</mosaic_0001>

<bundles_post_ra>
// kernel: tpu_custom_call.1
= control target key start
LH: loop header
LB: loop body
LE: loop exit
PB: predicated region body
PF: predicated region fallthrough
CT: control target
= control target key end

     0   :  { %s5821_s0 = inlined_call_operand.hbm [shape: f32[2,16,128], index: 0, kind: input, shape index: {}, may-alias: {0,19}]   ;;  %s5822_s1 = inlined_call_operand.vmem [shape: f32[2,16,128], index: 1, kind: input, shape index: {}]   ;;  %s5823_s2 = inlined_call_operand.vmem [shape: f32[2,1,16], index: 2, kind: input, shape index: {}]   ;;  %s5824_s3 = inlined_call_operand.hbm [shape: bf16[2,128,128], index: 3, kind: input, shape index: {}]   ;;  %s5825_s4 = inlined_call_operand.vmem [shape: f32[2,1,128], index: 4, kind: input, shape index: {}]   ;;  %s5826_s5 = inlined_call_operand.hbm [shape: bf16[2,128,128], index: 5, kind: input, shape index: {}]   ;;  %s5827_s6 = inlined_call_operand.vmem [shape: f32[2,1,128], index: 6, kind: input, shape index: {}]   ;;  %s5828_s7 = inlined_call_operand.hbm [shape: bf16[2,128,128], index: 7, kind: input, shape index: {}]   ;;  %s5829_s8 = inlined_call_operand.vmem [shape: f32[2,1,128], index: 8, kind: input, shape index: {}]   ;;  %s5830_s9 = inlined_call_operand.hbm [shape: bf16[2,8,16,128], index: 9, kind: input, shape index: {}]   ;;  %s5831_s10 = inlined_call_operand.vmem [shape: f32[2,1,128], index: 10, kind: input, shape index: {}]   ;;  %s5832_s11 = inlined_call_operand.hbm [shape: bf16[2,128,256], index: 11, kind: input, shape index: {}]   ;;  %s5833_s12 = inlined_call_operand.vmem [shape: f32[2,1,256], index: 12, kind: input, shape index: {}]   ;;  %s5834_s13 = inlined_call_operand.hbm [shape: bf16[2,256,128], index: 13, kind: input, shape index: {}]   ;;  %s5835_s14 = inlined_call_operand.vmem [shape: f32[2,1,128], index: 14, kind: input, shape index: {}]   ;;  %s5836_s15 = inlined_call_operand.vmem [shape: f32[2,1,128], index: 15, kind: input, shape index: {}]   ;;  %s5837_s16 = inlined_call_operand.vmem [shape: f32[2,1,128], index: 16, kind: input, shape index: {}]   ;;  %s5838_s17 = inlined_call_operand.vmem [shape: f32[2,1,128], index: 17, kind: input, shape index: {}]   ;;  %s5839_s18 = inlined_call_operand.vmem [shape: f32[2,1,128], index: 18, kind: input, shape index: {}]   ;;  %s5840_s19 = inlined_call_operand.hbm [shape: f32[2,16,128], index: 19, kind: output, shape index: {}, may-alias: {0,19}]  }
   0x1   :  { %5890 = sst [smem:[#allocation42_spill]] %s5821_s0 }
   0x2   :  { %5891 = sst [smem:[#allocation43_spill]] %s5822_s1 }
   0x3   :  { %5892 = sst [smem:[#allocation44_spill]] %s5823_s2 }
   0x4   :  { %5893 = sst [smem:[#allocation45_spill]] %s5824_s3 }
   0x5   :  { %5894 = sst [smem:[#allocation46_spill]] %s5825_s4 }
   0x6   :  { %5895 = sst [smem:[#allocation47_spill]] %s5826_s5 }
   0x7   :  { %5896 = sst [smem:[#allocation48_spill]] %s5827_s6 }
   0x8   :  { %5897 = sst [smem:[#allocation49_spill]] %s5828_s7 }
   0x9   :  { %5898 = sst [smem:[#allocation50_spill]] %s5829_s8 }
   0xa   :  { %5899 = sst [smem:[#allocation51_spill]] %s5830_s9 }
   0xb   :  { %5900 = sst [smem:[#allocation52_spill]] %s5831_s10 }
   0xc   :  { %5901 = sst [smem:[#allocation53_spill]] %s5832_s11 }
   0xd   :  { %5902 = sst [smem:[#allocation54_spill]] %s5833_s12 }
   0xe   :  { %5903 = sst [smem:[#allocation55_spill]] %s5834_s13 }
   0xf   :  { %5904 = sst [smem:[#allocation56_spill]] %s5835_s14 }
  0x10   :  { %5905 = sst [smem:[#allocation57_spill]] %s5836_s15 }
  0x11   :  { %5906 = sst [smem:[#allocation58_spill]] %s5837_s16 }
  0x12   :  { %5907 = sst [smem:[#allocation59_spill]] %s5838_s17 }
  0x13   :  { %5908 = sst [smem:[#allocation60_spill]] %s5839_s18 }
  0x14   :  { %5909 = sst [smem:[#allocation61_spill]] %s5840_s19 }
  0x15   :  { %24 = vsyncpa [#allocation3], 0 }
  0x16   :  { %26 = vsyncpa [#allocation3 + $0x1], 0 }
  0x17   :  { %27 = vsyncpa [#allocation6], 0 }
  0x18   :  { %29 = vsyncpa [#allocation6 + $0x1], 0 }
  0x19   :  { %30 = vsyncpa [#allocation9], 0 }
  0x1a   :  { %32 = vsyncpa [#allocation9 + $0x1], 0 }
  0x1b   :  { %33 = vsyncpa [#allocation12], 0 }
  0x1c   :  { %35 = vsyncpa [#allocation12 + $0x1], 0 }
  0x1d   :  { %36 = vsyncpa [#allocation4], 0 }
  0x1e   :  { %38 = vsyncpa [#allocation4 + $0x1], 0  ;;  %s4820_s0 = smov 0   ;;  %s4822_s30 = smov 0  }
  0x1f   :  { %s4824_s20 = smov 0   ;;  %s4826_s21 = smov 0  }
  0x20   :  { %s4828_s1 = smov 0   ;;  %s4830_s22 = smov 0  }
  0x21   :  { %s4832_s2 = smov 0   ;;  %s4834_s23 = smov 0  }
  0x22   :  { %s4836_s24 = smov 0   ;;  %s4838_s25 = smov 0  }
  0x23   :  { %s4840_s3 = smov 0  }
  0x24 LB: > { %5910 = sst [smem:[#allocation20_spill]] %s4658_s30  ;;  %s53_s26 = sadd.s32 1, %s4686_s24  ;;  %s4694_s3 = sphi %s4840_s3, %s44_s3   ;;  %s4690_s25 = sphi %s4838_s25, %s6021_s25   ;;  %s4686_s24 = sphi %s4836_s24, %s6020_s24   ;;  %s4682_s23 = sphi %s4834_s23, %s6019_s23   ;;  %s4678_s2 = sphi %s4832_s2, %s6018_s2   ;;  %s4674_s22 = sphi %s4830_s22, %s6017_s22   ;;  %s4670_s1 = sphi %s4828_s1, %s6016_s1   ;;  %s4666_s21 = sphi %s4826_s21, %s6015_s21   ;;  %s4662_s20 = sphi %s4824_s20, %s6014_s20   ;;  %s4658_s30 = sphi %s4822_s30, %s6013_s30   ;;  %s4654_s0 = sphi %s4820_s0, %s6012_s0  }
  0x25   : > { %5911 = sst [smem:[#allocation21_spill]] %s4662_s20  ;;  %p5848_p0 = scmp.eq.s32.totalorder %s4694_s3, 0 }
  0x26   : > { %5912 = sst [smem:[#allocation22_spill]] %s4666_s21  ;;  %p4877_p1 = scmp.ge.s32.totalorder %s53_s26, 2 }
  0x27   : > { %5913 = sst [smem:[#allocation23_spill]] %s4670_s1  ;;  %s141_s28 = sadd.s32 1, %s4662_s20 }
  0x28   : > { %5914 = sst [smem:[#allocation24_spill]] %s4674_s22  ;;  %p148_p2 = scmp.ne.s32.totalorder %s4662_s20, %s4658_s30 }
  0x29   : > { %5915 = sst [smem:[#allocation25_spill]] %s4678_s2  ;;  %s6023_s26 = smov (%p4877_p1, %s53_s26), 0 }
  0x2a   : > { %5916 = sst [smem:[#allocation26_spill]] %s4682_s23  ;;  %p150_p3 = por %p148_p2, %p5848_p0 }
  0x2b   : > { %5917 = sst [smem:[#allocation27_spill]] %s4686_s24  ;;  %s138_s29 = ssub.s32 %s4686_s24, %s6023_s26 }
  0x2c   : > { %5918 = sst [smem:[#allocation28_spill]] %s4690_s25  ;;  %p5847_p4 = scmp.lt.s32.totalorder %s4694_s3, 4 }
  0x2d   : > { %5919 = sst [smem:[#allocation29_spill]] %s4694_s3  ;;  %p139_p5 = scmp.eq.s32.totalorder %s138_s29, 0 }
  0x2e   : > { %s5920_s27 = scalar_select %p4877_p1, 1, 0 }
  0x2f   : > { %5921 = sst [smem:[#allocation30_spill]] %s6023_s26  ;;  %s4894_s19 = sand.u32 1, %s4694_s3  }
  0x30   : > { %s5845_s18 = sand.u32 1, %s4662_s20   ;;  %s4905_s15 = sshll.u32 %s4686_s24, 10 }
  0x31   : > { %s4898_s17 = scalar_select %p139_p5, %s4662_s20, %s141_s28  }
  0x32   : > { %s4902_s16 = sshll.u32 %s5845_s18, 6  ;;  %s5923_s10 = sld [smem:[#allocation45_spill]] }
  0x33   : > { %5922 = sst [smem:[#allocation31_spill]] %s4898_s17  ;;  %s633_s29 = scalar_lea.vmem [#allocation5], %s4902_s16 }
  0x34   : > { %s640_s26 = sshll.u32 %s633_s29, 4  ;;  %p4916_p6 = pnand %p5847_p4, %p150_p3  ;;  %s4920_s26 = int_to_ptr.vmem [resolvable:$true] %s640_s26 }
  0x36   : > { %s5924_s28 = scalar_select %p4916_p6, 1, 0 }
  0x37   : > { %p4927_p8 = pneg %p4916_p6 }
  0x38   : > { %s4911_s8 = scalar_lea.hbm %s5923_s10, %s4905_s15  ;;  %s4355_s6 = scalar_lea.hbm %s5923_s10, 2048 }
  0x39   : > { %s4350_s17 = scalar_lea.hbm %s4911_s8, 1024  ;;  %p4356_p11 = scmp.lt.u32.totalorder %s4911_s8, %s5923_s10 }
  0x3a   : > { %p4351_p7 = scmp.ne.s32.totalorder %s4911_s8, %s4350_s17  ;;  %p4357_p12 = scmp.lt.u32.totalorder %s4355_s6, %s4350_s17 }
  0x3b   : > { %p4359_p2 = scmp.lt.u32.totalorder %s4350_s17, %s4911_s8 }
  0x3c   : > { %p4353_p9 = pnand %p4927_p8, %p4351_p7  ;;  %p4358_p13 = por %p4357_p12, %p4356_p11 }
  0x3e   : > { %p4354_p10 = pneg %p4353_p9  ;;  %p4360_p3 = por %p4359_p2, %p4358_p13 }
  0x40   : > { %p4361_p5 = pnand %p4360_p3, %p4354_p10 }
  0x42   : > { %4364 = shalt.err (!%p4361_p5)
}
  0x43   : > { %s4365_s18 = scalar_lea.vmem %s4920_s26, 1024  ;;  %s4696_s14 = smov [#allocation5]  }
  0x44   : > { %p4366_p7 = scmp.ne.s32.totalorder %s4920_s26, %s4365_s18  ;;  %s4370_s29 = sshll.u32 %s4696_s14, 4  ;;  %s4371_s29 = int_to_ptr.vmem [resolvable:$false] %s4370_s29 }
  0x45   : > { %s4372_s4 = scalar_lea.vmem %s4371_s29, 2048  ;;  %p4373_p0 = scmp.lt.s32.totalorder %s4920_s26, %s4371_s29 }
  0x46   : > { %p4368_p9 = pnand %p4366_p7, %p4927_p8  ;;  %p4374_p1 = scmp.lt.s32.totalorder %s4372_s4, %s4365_s18 }
  0x48   : > { %p4369_p4 = pneg %p4368_p9  ;;  %p4375_p11 = por %p4374_p1, %p4373_p0 }
  0x4a   : > { %p4376_p12 = pnand %p4375_p11, %p4369_p4 }
  0x4c   : > { %4379 = shalt.err (!%p4376_p12)
}
  0x4d   : > { %s5852_s6 = smov 64   ;;  %s5854_s17 = smov 4  }
  0x4e   : > { %s5926_s18 = scalar_lea.sflag [#allocation6], %s4894_s19  ;;  %p3616_p0 = scmp.ge.s32.totalorder %s4694_s3, 1 }
  0x4f   : > { %4078 = dma.hbm_to_vmem [thread:$0]  (!%p4916_p6), %s4911_s8, 1024, %s4920_s26, %s5926_s18, %s5852_s6, %s5852_s6, %s5854_s17  }
  0x50   : > { %p814_p1 = scmp.lt.s32.totalorder %s4694_s3, 5  ;;  %s5929_s7 = sld [smem:[#allocation49_spill]] }
  0x51   : > { %s687_s10 = scalar_lea.vmem [#allocation8], %s4902_s16  ;;  %s5858_s8 = scalar_lea.sflag [#allocation9], %s4894_s19 }
  0x52   : > { %p4957_p4 = pnand %p3616_p0, %p814_p1  ;;  %s694_s23 = sshll.u32 %s687_s10, 4  ;;  %s4968_s23 = int_to_ptr.vmem [resolvable:$true] %s694_s23 }
  0x54   : > { %s5927_s2 = scalar_select %p4957_p4, 1, 0 }
  0x56   : > { %5928 = sst [smem:[#allocation32_spill]] %s5927_s2  ;;  %s4965_s4 = scalar_lea.hbm %s5929_s7, %s4905_s15 }
  0x57   : > { %s4380_s26 = scalar_lea.hbm %s4965_s4, 1024  ;;  %s4385_s14 = scalar_lea.hbm %s5929_s7, 2048 }
  0x58   : > { %p4381_p10 = scmp.ne.s32.totalorder %s4965_s4, %s4380_s26  ;;  %p4386_p3 = scmp.lt.u32.totalorder %s4965_s4, %s5929_s7 }
  0x59   : > { %p4387_p5 = scmp.lt.u32.totalorder %s4385_s14, %s4380_s26  ;;  %p4389_p9 = scmp.lt.u32.totalorder %s4380_s26, %s4965_s4 }
  0x5a   : > { %p4383_p13 = pnand %p4381_p10, %p4927_p8 }
  0x5b   : > { %p4388_p7 = por %p4387_p5, %p4386_p3 }
  0x5c   : > { %p4384_p2 = pneg %p4383_p13 }
  0x5d   : > { %p4390_p11 = por %p4389_p9, %p4388_p7 }
  0x5f   : > { %p4391_p12 = pnand %p4390_p11, %p4384_p2 }
  0x61   : > { %4394 = shalt.err (!%p4391_p12)
}
  0x62   : > { %s4395_s10 = scalar_lea.vmem %s4968_s23, 1024  ;;  %s4699_s6 = smov [#allocation8]  }
  0x63   : > { %p4396_p0 = scmp.ne.s32.totalorder %s4968_s23, %s4395_s10  ;;  %s4400_s18 = sshll.u32 %s4699_s6, 4  ;;  %s4401_s18 = int_to_ptr.vmem [resolvable:$false] %s4400_s18 }
  0x64   : > { %s4402_s17 = scalar_lea.vmem %s4401_s18, 2048  ;;  %p4403_p13 = scmp.lt.s32.totalorder %s4968_s23, %s4401_s18 }
  0x65   : > { %p4398_p1 = pnand %p4396_p0, %p4927_p8  ;;  %p4404_p4 = scmp.lt.s32.totalorder %s4402_s17, %s4395_s10 }
  0x67   : > { %p4399_p10 = pneg %p4398_p1  ;;  %p4405_p3 = por %p4404_p4, %p4403_p13 }
  0x69   : > { %p4406_p5 = pnand %p4405_p3, %p4399_p10 }
  0x6b   : > { %4409 = shalt.err (!%p4406_p5)
}
  0x6c   : > { %s5930_s26 = smov 4   ;;  %s5931_s14 = smov 64  }
  0x6d   : > { %4084 = dma.hbm_to_vmem [thread:$0]  (!%p4916_p6), %s4965_s4, 1024, %s4968_s23, %s5858_s8, %s5931_s14, %s5931_s14, %s5930_s26  }
  0x6e   : > { %s5932_s29 = sand.u32 1, %s4662_s20   ;;  %s5859_s6 = sshll.u32 %s4686_s24, 11 }
  0x6f   : > { %s4999_s10 = sshll.u32 %s5932_s29, 7  ;;  %s5933_s11 = sld [smem:[#allocation53_spill]] }
  0x70   : > { %s741_s2 = scalar_lea.vmem [#allocation11], %s4999_s10  ;;  %s5861_s23 = scalar_lea.sflag [#allocation12], %s4894_s19 }
  0x71   : > { %s748_s9 = sshll.u32 %s741_s2, 4  ;;  %s5010_s9 = int_to_ptr.vmem [resolvable:$true] %s748_s9 }
  0x75   : > { %s5007_s7 = scalar_lea.hbm %s5933_s11, %s5859_s6  ;;  %s4415_s18 = scalar_lea.hbm %s5933_s11, 4096 }
  0x76   : > { %s4410_s4 = scalar_lea.hbm %s5007_s7, 2048  ;;  %p4416_p9 = scmp.lt.u32.totalorder %s5007_s7, %s5933_s11 }
  0x77   : > { %p4411_p4 = scmp.ne.s32.totalorder %s5007_s7, %s4410_s4  ;;  %p4417_p11 = scmp.lt.u32.totalorder %s4415_s18, %s4410_s4 }
  0x78   : > { %p4419_p0 = scmp.lt.u32.totalorder %s4410_s4, %s5007_s7 }
  0x79   : > { %p4413_p2 = pnand %p4411_p4, %p4927_p8  ;;  %p4418_p12 = por %p4417_p11, %p4416_p9 }
  0x7b   : > { %p4414_p7 = pneg %p4413_p2  ;;  %p4420_p1 = por %p4419_p0, %p4418_p12 }
  0x7d   : > { %p4421_p10 = pnand %p4420_p1, %p4414_p7 }
  0x7f   : > { %4424 = shalt.err (!%p4421_p10)
}
  0x80   : > { %s4425_s2 = scalar_lea.vmem %s5010_s9, 2048  ;;  %s4700_s8 = smov [#allocation11]  }
  0x81   : > { %p4426_p13 = scmp.ne.s32.totalorder %s5010_s9, %s4425_s2  ;;  %s4430_s29 = sshll.u32 %s4700_s8, 4  ;;  %s4431_s29 = int_to_ptr.vmem [resolvable:$false] %s4430_s29 }
  0x82   : > { %s4432_s6 = scalar_lea.vmem %s4431_s29, 4096  ;;  %p4433_p4 = scmp.lt.s32.totalorder %s5010_s9, %s4431_s29 }
  0x83   : > { %p4428_p3 = pnand %p4426_p13, %p4927_p8  ;;  %p4434_p2 = scmp.lt.s32.totalorder %s4432_s6, %s4425_s2 }
  0x85   : > { %p4429_p5 = pneg %p4428_p3  ;;  %p4435_p9 = por %p4434_p2, %p4433_p4 }
  0x87   : > { %p4436_p11 = pnand %p4435_p9, %p4429_p5 }
  0x89   : > { %4439 = shalt.err (!%p4436_p11)
}
  0x8a   : > { %s5862_s4 = smov 128   ;;  %s5863_s18 = smov 8  }
  0x8b   : > { %4090 = dma.hbm_to_vmem [thread:$0]  (!%p4916_p6), %s5007_s7, 2048, %s5010_s9, %s5861_s23, %s5862_s4, %s5862_s4, %s5863_s18  }
  0x8c   : > { %p154_p7 = scmp.ne.s32.totalorder %s4658_s30, %s4654_s0  ;;  %s5934_s17 = sshll.u32 %s4686_s24, 11 }
  0x8d   : > { %s5935_s13 = sld [smem:[#allocation55_spill]]  ;;  %s769_s6 = scalar_lea.vmem [#allocation13], %s4999_s10 }
  0x8e   : > { %s5049_s11 = sshll.u32 %s769_s6, 4  ;;  %s5052_s20 = sadd.s32 4294967295, %s4694_s3   ;;  %s5194_s11 = int_to_ptr.vmem [resolvable:$true] %s5049_s11 }
  0x8f   : > { %5936 = sst [smem:[#allocation33_spill]] %s5052_s20  ;;  %s3592_s7 = sadd.s32 4294967294, %s4694_s3  }
  0x90   : > { %s56_s9 = sadd.s32 1, %s4690_s25  ;;  %p5937_p12 = scmp.ne.s32.totalorder %s5920_s27, 0 }
  0x91   : > { %s63_s23 = sadd.s32 1, %s4674_s22  ;;  %p70_p0 = scmp.ne.s32.totalorder %s4674_s22, %s4670_s1 }
  0x92   : > { %s6025_s9 = smov (!%p5937_p12, %s56_s9), %s4690_s25  ;;  %p76_p10 = scmp.ne.s32.totalorder %s4670_s1, %s4666_s21 }
  0x93   : > { %s5046_s29 = scalar_lea.hbm %s5935_s13, %s5934_s17  ;;  %p58_p1 = scmp.ge.s32.totalorder %s6025_s9, 2 }
  0x94   : > { %p5938_p13 = scmp.eq.s32.totalorder %s4694_s3, 0  ;;  %p77_p5 = scmp.eq.s32.totalorder %s5052_s20, 0 }
  0x95   : > { %s6027_s9 = smov (%p58_p1, %s6025_s9), 0  ;;  %p568_p9 = scmp.eq.s32.totalorder %s5052_s20, 3 }
  0x96   : > { %p5066_p3 = por %p5938_p13, %p70_p0  ;;  %5940 = sst [smem:[#allocation34_spill]] %s6027_s9 }
  0x97   : > { %p5076_p4 = por %p77_p5, %p76_p10  ;;  %p5083_p2 = por %p154_p7, %p77_p5 }
  0x98   : > { %s60_s2 = ssub.s32 %s4690_s25, %s6027_s9  ;;  %p574_p12 = scmp.eq.s32.totalorder %s3592_s7, 3 }
  0x99   : > { %s5941_s27 = scalar_select %p5076_p4, 1, 0 }
  0x9a   : > { %s5942_s17 = scalar_select %p5083_p2, 1, 0 }
  0x9b   : > { %p61_p11 = scmp.eq.s32.totalorder %s60_s2, 0  ;;  %p5090_p1 = por %p568_p9, %p70_p0 }
  0x9c   : > { %5943 = sst [smem:[#allocation35_spill]] %s5942_s17  ;;  %s594_s6 = sand.u32 1, %s4674_s22  }
  0x9d   : > { %s5944_s8 = scalar_select %p5090_p1, 1, 0 }
  0x9e   : > { %s5096_s4 = scalar_select %p61_p11, %s4674_s22, %s63_s23  }
  0x9f   : > { %5945 = sst [smem:[#allocation36_spill]] %s5944_s8  ;;  %p5101_p13 = por %p574_p12, %p76_p10 }
  0xa0   : > { %5946 = sst [smem:[#allocation37_spill]] %s5096_s4  ;;  %s3595_s0 = sshll.u32 %s594_s6, 4 }
  0xa1   : > { %s5947_s18 = scalar_select %p5101_p13, 1, 0 }
  0xa2   : > { %s3746_s24 = sshll.u32 %s4690_s25, 8  ;;  %s5949_s9 = sld [smem:[#allocation42_spill]] }
  0xa3   : > { %5948 = sst [smem:[#allocation38_spill]] %s5947_s18  ;;  %s598_s7 = scalar_lea.vmem [#allocation2], %s3595_s0 }
  0xa4   : > { %s605_s2 = sshll.u32 %s598_s7, 4  ;;  %p5950_p7 = scmp.lt.s32.totalorder %s4694_s3, 4  ;;  %s5119_s2 = int_to_ptr.vmem [resolvable:$true] %s605_s2 }
  0xa5   : > { %s5952_s5 = sld [smem:[#allocation47_spill]]  ;;  %s5127_s17 = scalar_lea.sflag [#allocation3], %s594_s6 }
  0xa6   : > { %p5115_p0 = pnand %p5950_p7, %p5066_p3 }
  0xa8   : > { %s5109_s20 = scalar_lea.hbm %s5949_s9, %s3746_s24  ;;  %p4442_p5 = pneg %p5115_p0 }
  0xa9   : > { %s4440_s4 = scalar_lea.hbm %s5109_s20, 256  ;;  %s4445_s7 = scalar_lea.hbm %s5949_s9, 512 }
  0xaa   : > { %p4441_p10 = scmp.ne.s32.totalorder %s5109_s20, %s4440_s4  ;;  %p4446_p11 = scmp.lt.u32.totalorder %s5109_s20, %s5949_s9 }
  0xab   : > { %s5125_s24 = scalar_lea.hbm %s5952_s5, %s4905_s15  ;;  %p4447_p12 = scmp.lt.u32.totalorder %s4445_s7, %s4440_s4 }
  0xac   : > { %p4443_p3 = pnand %p4442_p5, %p4441_p10  ;;  %p4449_p13 = scmp.lt.u32.totalorder %s4440_s4, %s5109_s20 }
  0xad   : > { %p4448_p7 = por %p4447_p12, %p4446_p11 }
  0xae   : > { %p4444_p9 = pneg %p4443_p3 }
  0xaf   : > { %p4450_p1 = por %p4449_p13, %p4448_p7 }
  0xb1   : > { %p4451_p2 = pnand %p4450_p1, %p4444_p9 }
  0xb3   : > { %4454 = shalt.err (!%p4451_p2)
}
  0xb4   : > { %s4455_s25 = scalar_lea.vmem %s5119_s2, 256  ;;  %s4703_s6 = smov [#allocation2]  }
  0xb5   : > { %p4456_p10 = scmp.ne.s32.totalorder %s5119_s2, %s4455_s25  ;;  %s4460_s30 = sshll.u32 %s4703_s6, 4  ;;  %s4461_s30 = int_to_ptr.vmem [resolvable:$false] %s4460_s30 }
  0xb6   : > { %s4462_s22 = scalar_lea.vmem %s4461_s30, 512  ;;  %p4463_p6 = scmp.lt.s32.totalorder %s5119_s2, %s4461_s30 }
  0xb7   : > { %p4458_p3 = pnand %p4456_p10, %p4442_p5  ;;  %p4464_p11 = scmp.lt.s32.totalorder %s4462_s22, %s4455_s25 }
  0xb9   : > { %p4459_p4 = pneg %p4458_p3  ;;  %p4465_p12 = por %p4464_p11, %p4463_p6 }
  0xbb   : > { %p4466_p13 = pnand %p4465_p12, %p4459_p4 }
  0xbd   : > { %4469 = shalt.err (!%p4466_p13)
}
  0xbe   : > { %s5953_s4 = smov 8   ;;  %s5954_s18 = smov 128  }
  0xbf   : > { %4075 = dma.hbm_to_vmem [thread:$0]  (!%p5115_p0), %s5109_s20, 256, %s5119_s2, %s5127_s17, %s5954_s18, %s5954_s18, %s5953_s4  }
  0xc0   : > { %s660_s10 = scalar_lea.vmem [#allocation7], %s4902_s16  ;;  %s5955_s25 = sld [smem:[#allocation51_spill]] }
  0xc1   : > { %s667_s0 = sshll.u32 %s660_s10, 4  ;;  %s4470_s22 = scalar_lea.hbm %s5125_s24, 1024  ;;  %s5159_s0 = int_to_ptr.vmem [resolvable:$true] %s667_s0 }
  0xc2   : > { %p4471_p6 = scmp.ne.s32.totalorder %s5125_s24, %s4470_s22  ;;  %s4475_s3 = scalar_lea.hbm %s5952_s5, 2048 }
  0xc3   : > { %p4476_p1 = scmp.lt.u32.totalorder %s5125_s24, %s5952_s5  ;;  %p4477_p0 = scmp.lt.u32.totalorder %s4475_s3, %s4470_s22 }
  0xc4   : > { %p4473_p4 = pnand %p4471_p6, %p4927_p8  ;;  %p4479_p9 = scmp.lt.u32.totalorder %s4470_s22, %s5125_s24 }
  0xc5   : > { %p4478_p5 = por %p4477_p0, %p4476_p1 }
  0xc6   : > { %s5956_s6 = smov %s5955_s25  ;;  %s5165_s30 = scalar_lea.hbm %s5955_s25, %s4905_s15 }
  0xc7   : > { %p4474_p2 = pneg %p4473_p4  ;;  %p4480_p7 = por %p4479_p9, %p4478_p5 }
  0xc9   : > { %p4481_p10 = pnand %p4480_p7, %p4474_p2 }
  0xcb   : > { %4484 = shalt.err (!%p4481_p10)
}
  0xcc   : > { %s4485_s15 = scalar_lea.vmem %s5159_s0, 1024  ;;  %s4704_s21 = smov [#allocation7]  }
  0xcd   : > { %p4486_p3 = scmp.ne.s32.totalorder %s5159_s0, %s4485_s15  ;;  %s4490_s9 = sshll.u32 %s4704_s21, 4  ;;  %s4491_s9 = int_to_ptr.vmem [resolvable:$false] %s4490_s9 }
  0xce   : > { %s4492_s8 = scalar_lea.vmem %s4491_s9, 2048  ;;  %p4493_p13 = scmp.lt.s32.totalorder %s5159_s0, %s4491_s9 }
  0xcf   : > { %p4488_p11 = pnand %p4486_p3, %p4927_p8  ;;  %p4494_p6 = scmp.lt.s32.totalorder %s4492_s8, %s4485_s15 }
  0xd1   : > { %p4489_p12 = pneg %p4488_p11  ;;  %p4495_p4 = por %p4494_p6, %p4493_p13 }
  0xd3   : > { %p4496_p1 = pnand %p4495_p4, %p4489_p12 }
  0xd5   : > { %4499 = shalt.err (!%p4496_p1)
}
  0xd6   : > { %p5957_p2 = scmp.ne.s32.totalorder %s5924_s28, 0  ;;  %s5958_s3 = scalar_lea.sflag [#allocation6], %s4894_s19 }
  0xd7   : > { %s714_s2 = scalar_lea.vmem [#allocation10], %s4902_s16  ;;  %s4500_s4 = scalar_lea.hbm %s5165_s30, 1024 }
  0xd8   : > { %4081 = dma.hbm_to_vmem [thread:$0]  (!%p5957_p2), %s5125_s24, 1024, %s5159_s0, %s5958_s3, %s5931_s14, %s5931_s14, %s5930_s26  }
  0xd9   : > { %s721_s17 = sshll.u32 %s714_s2, 4  ;;  %p4501_p0 = scmp.ne.s32.totalorder %s5165_s30, %s4500_s4  ;;  %s5197_s17 = int_to_ptr.vmem [resolvable:$true] %s721_s17 }
  0xda   : > { %s4505_s7 = scalar_lea.hbm %s5956_s6, 2048  ;;  %p4506_p7 = scmp.lt.u32.totalorder %s5165_s30, %s5956_s6 }
  0xdb   : > { %p4503_p5 = pnand %p4501_p0, %p4927_p8  ;;  %p4507_p10 = scmp.lt.u32.totalorder %s4505_s7, %s4500_s4 }
  0xdc   : > { %p4509_p11 = scmp.lt.u32.totalorder %s4500_s4, %s5165_s30 }
  0xdd   : > { %p4504_p9 = pneg %p4503_p5  ;;  %p4508_p3 = por %p4507_p10, %p4506_p7 }
  0xdf   : > { %p4510_p12 = por %p4509_p11, %p4508_p3 }
  0xe1   : > { %p4511_p13 = pnand %p4510_p12, %p4504_p9 }
  0xe3   : > { %4514 = shalt.err (!%p4511_p13)
}
  0xe4   : > { %s4515_s16 = scalar_lea.vmem %s5197_s17, 1024  ;;  %s4705_s24 = smov [#allocation10]  }
  0xe5   : > { %p4516_p6 = scmp.ne.s32.totalorder %s5197_s17, %s4515_s16  ;;  %s4520_s0 = sshll.u32 %s4705_s24, 4  ;;  %s4521_s0 = int_to_ptr.vmem [resolvable:$false] %s4520_s0 }
  0xe6   : > { %s4522_s22 = scalar_lea.vmem %s4521_s0, 2048  ;;  %p4523_p0 = scmp.lt.s32.totalorder %s5197_s17, %s4521_s0 }
  0xe7   : > { %p4518_p4 = pnand %p4516_p6, %p4927_p8  ;;  %p4524_p5 = scmp.lt.s32.totalorder %s4522_s22, %s4515_s16 }
  0xe9   : > { %p4519_p1 = pneg %p4518_p4  ;;  %p4525_p7 = por %p4524_p5, %p4523_p0 }
  0xeb   : > { %p4526_p10 = pnand %p4525_p7, %p4519_p1 }
  0xed   : > { %4529 = shalt.err (!%p4526_p10)
}
  0xee   : > { %s5959_s20 = scalar_lea.sflag [#allocation9], %s4894_s19  ;;  %s4530_s15 = scalar_lea.hbm %s5046_s29, 2048 }
  0xef   : > { %4087 = dma.hbm_to_vmem [thread:$0]  (!%p5957_p2), %s5165_s30, 1024, %s5197_s17, %s5959_s20, %s5931_s14, %s5931_s14, %s5930_s26  }
  0xf0   : > { %p4531_p9 = scmp.ne.s32.totalorder %s5046_s29, %s4530_s15  ;;  %s4535_s8 = scalar_lea.hbm %s5935_s13, 4096 }
  0xf1   : > { %p4536_p12 = scmp.lt.u32.totalorder %s5046_s29, %s5935_s13  ;;  %p4537_p13 = scmp.lt.u32.totalorder %s4535_s8, %s4530_s15 }
  0xf2   : > { %p4533_p3 = pnand %p4531_p9, %p4927_p8  ;;  %p4539_p4 = scmp.lt.u32.totalorder %s4530_s15, %s5046_s29 }
  0xf3   : > { %p4538_p6 = por %p4537_p13, %p4536_p12 }
  0xf4   : > { %p4534_p11 = pneg %p4533_p3 }
  0xf5   : > { %p4540_p1 = por %p4539_p4, %p4538_p6 }
  0xf7   : > { %p4541_p0 = pnand %p4540_p1, %p4534_p11 }
  0xf9   : > { %4544 = shalt.err (!%p4541_p0)
}
  0xfa   : > { %s4545_s30 = scalar_lea.vmem %s5194_s11, 2048  ;;  %s4706_s17 = smov [#allocation13]  }
  0xfb   : > { %p4546_p5 = scmp.ne.s32.totalorder %s5194_s11, %s4545_s30  ;;  %s4550_s4 = sshll.u32 %s4706_s17, 4  ;;  %s4551_s4 = int_to_ptr.vmem [resolvable:$false] %s4550_s4 }
  0xfc   : > { %s4552_s18 = scalar_lea.vmem %s4551_s4, 4096  ;;  %p4553_p9 = scmp.lt.s32.totalorder %s5194_s11, %s4551_s4 }
  0xfd   : > { %p4548_p7 = pnand %p4546_p5, %p4927_p8  ;;  %p4554_p3 = scmp.lt.s32.totalorder %s4552_s18, %s4545_s30 }
  0xff   : > { %p4549_p10 = pneg %p4548_p7  ;;  %p4555_p12 = por %p4554_p3, %p4553_p9 }
 0x101   : > { %p4556_p13 = pnand %p4555_p12, %p4549_p10 }
 0x103   : > { %4559 = shalt.err (!%p4556_p13)
}
 0x104   : > { %s5960_s10 = scalar_lea.sflag [#allocation12], %s4894_s19  ;;  %s5961_s12 = sld [smem:[#allocation32_spill]] }
 0x105   : > { %4093 = dma.hbm_to_vmem [thread:$0]  (!%p5957_p2), %s5046_s29, 2048, %s5194_s11, %s5960_s10, %s5931_s14, %s5931_s14, %s5930_s26  }
 0x10a   : > { %p5962_p8 = scmp.ne.s32.totalorder %s5961_s12, 0 }
 0x10c   : > { %818 = sbr.rel (%p5962_p8) target bundleno = 5116 (0x13fc), region = 96 }
 0x113   : > { %s5254_s7 = sand.u32 1, %s4670_s1   ;;  %p5963_p11 = scmp.ne.s32.totalorder %s5941_s27, 0 }
 0x114   : > { %s5884_s23 = sshll.u32 %s5254_s7, 4  ;;  %s821_s28 = scalar_lea.sflag [#allocation3], %s5254_s7 }
 0x115   : > { %s5260_s25 = scalar_lea.vmem [#allocation2], %s5884_s23 }
 0x116   : > { %4633 = dma.done.wait (%p5963_p11), %s821_s28, 256  }
 0x117   : > { %4635 = vsyncadd (%p5963_p11), %s821_s28, 4294967040  ;;  %s5964_s11 = sld [smem:[#allocation33_spill]]  ;;  %s5965_s19 = sld [smem:[#allocation20_spill]] }
 0x118   : > { %s5966_s26 = sld [smem:[#allocation35_spill]] }
 0x11d   : > { %s829_s14 = sand.u32 1, %s5964_s11   ;;  %s831_s29 = sand.u32 1, %s5965_s19  }
 0x11e   : > { %s3618_s16 = sshll.u32 %s831_s29, 6  ;;  %s830_s24 = scalar_lea.sflag [#allocation6], %s829_s14 }
 0x11f   : > { %s5268_s0 = scalar_lea.vmem [#allocation5], %s3618_s16  ;;  %p5967_p2 = scmp.ne.s32.totalorder %s5966_s26, 0 }
 0x121   : > { %4637 = dma.done.wait (%p5967_p2), %s830_s24, 2048  }
 0x122   : > { %4639 = vsyncadd (%p5967_p2), %s830_s24, 4294965248  ;;  %s5274_s22 = scalar_lea.vmem [#allocation7], %s3618_s16  ;;  %s848_s20 = scalar_lea.sflag [#allocation9], %s829_s14 }
 0x123   : > { %s5276_s27 = scalar_lea.vmem [#allocation8], %s3618_s16 }
 0x124   : > { %4641 = dma.done.wait (%p5967_p2), %s848_s20, 2048  }
 0x125   : > { %4643 = vsyncadd (%p5967_p2), %s848_s20, 4294965248  ;;  %s3622_s15 = sshll.u32 %s831_s29, 7  ;;  %s5282_s21 = scalar_lea.vmem [#allocation10], %s3618_s16 }
 0x126   : > { %5968 = sst [smem:[#allocation39_spill]] %s5282_s21  ;;  %s866_s9 = scalar_lea.sflag [#allocation12], %s829_s14 }
 0x127   : > { %s5284_s8 = scalar_lea.vmem [#allocation11], %s3622_s15 }
 0x128   : > { %5969 = sst [smem:[#allocation40_spill]] %s5284_s8 }
 0x129   : > { %4645 = dma.done.wait (%p5967_p2), %s866_s9, 4096  }
 0x12a   : > { %4647 = vsyncadd (%p5967_p2), %s866_s9, 4294963200  ;;  %s5970_s3 = sld [smem:[#allocation26_spill]]  ;;  %s5971_s2 = sld [smem:[#allocation25_spill]] }
 0x12b   : > { %s5974_s19 = sld [smem:[#allocation43_spill]]  ;;  %s5979_s11 = sld [smem:[#allocation54_spill]] }
 0x12c   : > { %s5980_s16 = sld [smem:[#allocation56_spill]]  ;;  %s5981_s9 = sld [smem:[#allocation57_spill]] }
 0x12d   : > { %s5982_s6 = sld [smem:[#allocation58_spill]]  ;;  %s5983_s18 = sld [smem:[#allocation59_spill]] }
 0x12e   : > { %s5985_s14 = sshll.u32 %s5254_s7, 4 }
 0x12f   : > { %s5354_s29 = scalar_lea.vmem [#allocation14], %s5985_s14 }
 0x130   : > { %p1002_p6 = scmp.lt.s32.totalorder %s5970_s3, 1  ;;  %p1010_p4 = scmp.lt.s32.totalorder %s5971_s2, 1 }
 0x131   : > { %p3628_p1 = scmp.ne.s32.totalorder %s5971_s2, 0 }
 0x132   : > { %s6029_s3 = smov (!%p1002_p6, %s5970_s3), 1  ;;  %v1046_v0 = vld [vmem:[%s5260_s25] sm:$0xff] (!%p3628_p1)  ;;  %v1047_v1 = vld [vmem:[%s5260_s25 + $0x8] sm:$0xff] (!%p3628_p1) }
 0x133   : > { %5972 = sst [smem:[#allocation41_spill]] %s6029_s3  ;;  %s3753_s17 = sshll.u32 %s6029_s3, 4  ;;  %1048 = vst [vmem:[%s5354_s29] sm:$0xff] (!%p3628_p1), %v1046_v0  ;;  %1049 = vst [vmem:[%s5354_s29 + $0x8] sm:$0xff] (!%p3628_p1), %v1047_v1 }
 0x134   : > { %s5296_s30 = scalar_select %p1010_p4, %s5971_s2, 1 }
 0x135   : > { %s5306_s26 = scalar_lea.vmem %s5974_s19, %s3753_s17 }
 0x136   : > { %s3627_s12 = sshll.u32 %s5296_s30, 1  ;;  %s1028_s24 = scalar_lea.vmem %s5980_s16, %s5296_s30 }
 0x137   : > { %s5328_s19 = scalar_lea.vmem %s5979_s11, %s3627_s12  ;;  %s1031_s5 = scalar_lea.vmem %s5981_s9, %s5296_s30 }
 0x138   : > { %s1034_s8 = scalar_lea.vmem %s5982_s6, %s5296_s30  ;;  %s1037_s10 = scalar_lea.vmem %s5983_s18, %s5296_s30 }
 0x139   : > { %s5984_s12 = sld [smem:[#allocation60_spill]]  ;;  %s5350_s11 = scalar_lea.vmem [#allocation13], %s3622_s15 }
 0x13a   : > { %1045 = sbr.rel (%p3628_p1) target bundleno = 321 (0x141), region = 128 }
 0x13f   : > { %s1040_s17 = scalar_lea.vmem %s5984_s12, %s5296_s30 }
 0x141 PF: > { %v4204_v2 = vld [vmem:[%s5274_s22] sm:$0xff]   ;;  %v4707_v3 = vmov 0.0   ;;  %v4205_v4 = vld [vmem:[%s5274_s22 + $0x8] sm:$0xff]   ;;  %vm4708_vm0 = vmmov 0   ;;  %v4207_v7 = vld [vmem:[%s5274_s22 + $0x10] sm:$0xff]   ;;  %vm1404_vm1 = vcmask 130048  }
 0x142   : > { %3872 = vmatprep.subr.bf16.mxu1 %v4707_v3  ;;  %3852 = vmatprep.subr.bf16.mxu0 %v4707_v3  ;;  %v4206_v5 = vld [vmem:[%s5268_s0] sm:$0xff]   ;;  %v4208_v6 = vld [vmem:[%s5268_s0 + $0x8] sm:$0xff]   ;;  %v4210_v8 = vld [vmem:[%s5268_s0 + $0x10] sm:$0xff]   ;;  %s4709_s20 = smov 112   ;;  %s5990_s23 = sld [smem:[#allocation41_spill]] }
 0x143   : > { %3873 = vmatpush3.bf16.msra.mxu1 %v4204_v2  ;;  %3888 = vmatprep.mubr.msk.bf16.mxu1 %vm4708_vm0, %v4707_v3  ;;  %v4209_v9 = vld [vmem:[%s5274_s22 + $0x18] sm:$0xff]   ;;  %v4211_v11 = vld [vmem:[%s5274_s22 + $0x20] sm:$0xff]   ;;  %v4213_v13 = vld [vmem:[%s5274_s22 + $0x28] sm:$0xff]   ;;  %s5991_s1 = sld [smem:[#allocation44_spill]]  ;;  %s5993_s4 = sld [smem:[#allocation50_spill]] }
 0x144   : > { %3874 = vmatprep.subr.bf16.mxu1 %v4707_v3  ;;  %3868 = vmatprep.mubr.msk.bf16.mxu0 %vm4708_vm0, %v4707_v3  ;;  %v4212_v10 = vld [vmem:[%s5268_s0 + $0x18] sm:$0xff]   ;;  %v4214_v12 = vld [vmem:[%s5268_s0 + $0x20] sm:$0xff]   ;;  %v4216_v14 = vld [vmem:[%s5268_s0 + $0x28] sm:$0xff]   ;;  %s5995_s28 = sld [smem:[#allocation39_spill]]  ;;  %s4710_s12 = smov 96  }
 0x145   : > { %3853 = vmatpush3.bf16.msra.mxu0 %v4206_v5  ;;  %v4215_v15 = vld [vmem:[%s5274_s22 + $0x30] sm:$0xff]   ;;  %v5393_v17 = vld [vmem:[%s5354_s29 + $0x8] sm:$0xff]  ;;  %v1052_v18 = vld [vmem:[%s5306_s26] sm:$0xff]  ;;  %s4711_s14 = smov 80   ;;  %s4712_s25 = smov 64  }
 0x146   : > { %3854 = vmatprep.subr.bf16.mxu0 %v4707_v3  ;;  %v5390_v16 = vld [vmem:[%s5354_s29] sm:$0xff]  ;;  %v1053_v19 = vld [vmem:[%s5306_s26 + $0x8] sm:$0xff]  ;;  %v4217_v21 = vld [vmem:[%s5274_s22 + $0x38] sm:$0xff]   ;;  %s5986_s22 = sld [smem:[#allocation48_spill]]  ;;  %s5988_s26 = sld [smem:[#allocation46_spill]] }
 0x147   : > { %3875 = vmatpush3.bf16.msra.mxu1 %v4205_v4  ;;  %v4218_v20 = vld [vmem:[%s5268_s0 + $0x30] sm:$0xff]   ;;  %v1056_v22 = vadd.f32 %v1052_v18, %v5390_v16  ;;  %v1057_v23 = vadd.f32 %v1053_v19, %v5393_v17  ;;  %v4219_v24 = vld [vmem:[%s5268_s0 + $0x38] sm:$0xff]   ;;  %v4220_v26 = vld [vmem:[%s5276_s27] sm:$0xff]   ;;  %v1055_v51 = vpack.c.bf16 %v5393_v17, %v5390_v16  ;;  %s4713_s0 = smov 48   ;;  %s4717_s2 = smov [#allocation14]  }
 0x148   : > { %3876 = vmatprep.subr.bf16.mxu1 %v4707_v3  ;;  %v4221_v27 = vld [vmem:[%s5276_s27 + $0x8] sm:$0xff]   ;;  %v4222_v39 = vld [vmem:[%s5276_s27 + $0x10] sm:$0xff]   ;;  %v4223_v46 = vld [vmem:[%s5276_s27 + $0x18] sm:$0xff]  }
 0x149   : > { %3855 = vmatpush3.bf16.msra.mxu0 %v4208_v6  ;;  %v1058_v25 = vpack.c.bf16 %v1057_v23, %v1056_v22  ;;  %v4224_v47 = vld [vmem:[%s5276_s27 + $0x20] sm:$0xff]   ;;  %v4225_v48 = vld [vmem:[%s5276_s27 + $0x28] sm:$0xff]   ;;  %v4226_v49 = vld [vmem:[%s5276_s27 + $0x30] sm:$0xff]   ;;  %s5992_s6 = scalar_lea.vmem %s5991_s1, %s5990_s23  ;;  %s5994_s18 = scalar_lea.vmem %s5993_s4, %s5296_s30 }
 0x14a   : > { %3856 = vmatprep.subr.bf16.mxu0 %v4707_v3  ;;  %v4227_v50 = vld [vmem:[%s5276_s27 + $0x38] sm:$0xff]   ;;  %v5463_v52 = vld [vmem:[%s5992_s6] ss:$0 sm:$0xff] }
 0x14b   : > { %3877 = vmatpush3.bf16.msra.mxu1 %v4207_v7  ;;  %v3647_v0 = vld [vmem:[%s5994_s18] ss:$0 sm:$0xff] }
 0x14c   : > { %3878 = vmatprep.subr.bf16.mxu1 %v4707_v3  ;;  %s5987_s15 = scalar_lea.vmem %s5986_s22, %s5296_s30  ;;  %s5989_s16 = scalar_lea.vmem %s5988_s26, %s5296_s30 }
 0x14d   : > { %3857 = vmatpush3.bf16.msra.mxu0 %v4210_v8  ;;  %v3638_v28 = vld [vmem:[%s5987_s15] ss:$0 sm:$0xff]  ;;  %s4714_s22 = smov 32   ;;  %s4715_s15 = smov 16  }
 0x14e   : > { %3858 = vmatprep.subr.bf16.mxu0 %v4707_v3  ;;  %v3629_v30 = vld [vmem:[%s5989_s16] ss:$0 sm:$0xff]  ;;  %s5996_s26 = sld [smem:[#allocation52_spill]] }
 0x14f   : > { %3879 = vmatpush3.bf16.msra.mxu1 %v4209_v9 }
 0x150   : > { %3880 = vmatprep.subr.bf16.mxu1 %v4707_v3 }
 0x151   : > { %3859 = vmatpush3.bf16.msra.mxu0 %v4212_v10 }
 0x152   : > { %3860 = vmatprep.subr.bf16.mxu0 %v4707_v3 }
 0x153   : > { %3881 = vmatpush3.bf16.msra.mxu1 %v4211_v11 }
 0x154   : > { %3882 = vmatprep.subr.bf16.mxu1 %v4707_v3  ;;  %s5997_s16 = scalar_lea.vmem %s5996_s26, %s5296_s30  ;;  %s3251_s30 = scalar_lea.sflag [#allocation4], %s5254_s7 }
 0x155   : > { %3861 = vmatpush3.bf16.msra.mxu0 %v4214_v12  ;;  %s4564_s26 = sshll.u32 %s4717_s2, 4  ;;  %s4565_s26 = int_to_ptr.vmem [resolvable:$false] %s4564_s26 }
 0x156   : > { %3862 = vmatprep.subr.bf16.mxu0 %v4707_v3 }
 0x157   : > { %3883 = vmatpush3.bf16.msra.mxu1 %v4213_v13 }
 0x158   : > { %3884 = vmatprep.subr.bf16.mxu1 %v4707_v3 }
 0x159   : > { %3863 = vmatpush3.bf16.msra.mxu0 %v4216_v14 }
 0x15a   : > { %3864 = vmatprep.subr.bf16.mxu0 %v4707_v3 }
 0x15b   : > { %3885 = vmatpush3.bf16.msra.mxu1 %v4215_v15 }
 0x15c   : > { %3886 = vmatprep.subr.bf16.mxu1 %v4707_v3 }
 0x15d   : > { %3865 = vmatpush3.bf16.msra.mxu0 %v4218_v20 }
 0x15e   : > { %3866 = vmatprep.subr.bf16.mxu0 %v4707_v3 }
 0x15f   : > { %3887 = vmatpush3.bf16.msra.mxu1 %v4217_v21 }
 0x160   : > { %3912 = vmatprep.subr.bf16.mxu1 %v4707_v3 }
 0x161   : > { %3867 = vmatpush3.bf16.msra.mxu0 %v4219_v24 }
 0x162   : > { %3889 = vmatmul.mubr.bf16.vlgmr.msra.gmra.mrb[0].mxu1 %v1058_v25  ;;  %3892 = vmatprep.subr.bf16.mxu0 %v4707_v3 }
 0x163   : > { %3914 = vmatprep.mubr.msk.bf16.mxu1 %vm4708_vm0, %v4707_v3 }
 0x164   : > { %3869 = vmatmul.mubr.bf16.vlgmr.msra.gmra.mrb[0].mxu0 %v1058_v25 }
 0x165   : > { %3908 = vmatprep.mubr.msk.bf16.mxu0 %vm4708_vm0, %v4707_v3  ;;  %3893 = vmatpush3.bf16.msra.mxu0 %v4220_v26 }
 0x166   : > { %3894 = vmatprep.subr.bf16.mxu0 %v4707_v3 }
 0x169   : > { %3895 = vmatpush3.bf16.msra.mxu0 %v4221_v27 }
 0x16a   : > { %3896 = vmatprep.subr.bf16.mxu0 %v4707_v3 }
 0x16d   : > { %3897 = vmatpush3.bf16.msra.mxu0 %v4222_v39 }
 0x16e   : > { %3898 = vmatprep.subr.bf16.mxu0 %v4707_v3 }
 0x171   : > { %3899 = vmatpush3.bf16.msra.mxu0 %v4223_v46  ;;  %v4228_v46 = vld [vmem:[%s5995_s28] sm:$0xff]  }
 0x172   : > { %3900 = vmatprep.subr.bf16.mxu0 %v4707_v3 }
 0x175   : > { %3901 = vmatpush3.bf16.msra.mxu0 %v4224_v47  ;;  %v4229_v47 = vld [vmem:[%s5995_s28 + $0x8] sm:$0xff]  }
 0x176   : > { %3902 = vmatprep.subr.bf16.mxu0 %v4707_v3 }
 0x179   : > { %3903 = vmatpush3.bf16.msra.mxu0 %v4225_v48 }
 0x17a   : > { %3904 = vmatprep.subr.bf16.mxu0 %v4707_v3 }
 0x17d   : > { %3905 = vmatpush3.bf16.msra.mxu0 %v4226_v49 }
 0x17e   : > { %3906 = vmatprep.subr.bf16.mxu0 %v4707_v3 }
 0x181   : > { %3907 = vmatpush3.bf16.msra.mxu0 %v4227_v50 }
 0x182   : > { %3936 = vmatprep.subr.bf16.mxu0 %v4707_v3 }
 0x184   : > { %3909 = vmatmul.mubr.bf16.vlgmr.msra.gmra.mrb[4].mxu0 %v1055_v51 }
 0x185   : > { %3938 = vmatprep.mubr.msk.bf16.mxu0 %vm4708_vm0, %v4707_v3  ;;  %3937 = vmatpush3.bf16.msra.mxu0 %v4229_v47 }
 0x186   : > { %3948 = vmatprep.subr.bf16.mxu0 %v4707_v3 }
 0x235   : > { %v1277_v29 = vpop.f32.mrb[0].mxu1 }
 0x236   : > { %v3890_v31 = vpop.f32.mrb[1].mxu1  ;;  %v1278_v34 = vadd.f32 %v3638_v28, %v1277_v29 }
 0x237   : > { %v1280_v32 = vpop.f32.mrb[2].mxu1  ;;  %v1164_v33 = vpop.f32.mrb[0].mxu0 }
 0x238   : > { %v1281_v35 = vadd.f32 %v3638_v28, %v1280_v32  ;;  %v3891_v36 = vpop.f32.mrb[3].mxu1  ;;  %v1165_v37 = vadd.f32 %v3629_v30, %v1164_v33  ;;  %v3870_v38 = vpop.f32.mrb[1].mxu0 }
 0x239   : > { %v1167_v40 = vpop.f32.mrb[2].mxu0 }
 0x23a   : > { %v5428_v41 = vpack.c.bf16 %v1281_v35, %v1278_v34  ;;  %v1168_v42 = vadd.f32 %v3629_v30, %v1167_v40  ;;  %v3871_v43 = vpop.f32.mrb[3].mxu0 }
 0x23c   : > { %1526 = vrot.lane.b32.xlu1 %v5428_v41, %s4709_s20  ;;  %v5432_v44 = vpack.c.bf16 %v1168_v42, %v1165_v37  ;;  %v1409_v45 = vsel %vm1404_vm1, %v5428_v41, 0 }
 0x23d   : > { %3913 = vmatpush3.bf16.xpose.msra.mxu1 %v1409_v45 }
 0x23e   : > { %3918 = vmatprep.subr.bf16.mxu1 %v4707_v3 }
 0x240   : > { %1523 = vrot.lane.b32.xlu1 %v5432_v44, %s4709_s20 }
 0x244   : > { %3915 = vmatmul.mubr.msk.bf16.vlgmr.msra.gmra.mrb[4].mxu1 %vm1404_vm1, %v5432_v44 }
 0x245   : > { %3920 = vmatprep.mubr.msk.bf16.mxu1 %vm4708_vm0, %v4707_v3 }
 0x257   : > { %v1390_v61 = vpop.f32.mrb[4].mxu0 }
 0x258   : > { %v3910_v62 = vpop.f32.mrb[5].mxu0  ;;  %v1391_v2 = vadd.f32 %v3647_v0, %v1390_v61 }
 0x259   : > { %v1393_v63 = vpop.f32.mrb[6].mxu0 }
 0x25a   : > { %v3911_v1 = vpop.f32.mrb[7].mxu0  ;;  %v1394_v4 = vadd.f32 %v3647_v0, %v1393_v63 }
 0x25c   : > { %v5474_v5 = vpack.c.bf16 %v1394_v4, %v1391_v2 }
 0x25e   : > { %3919 = vmatpush3.bf16.msra.mxu1 %v5474_v5 }
 0x25f   : > { %3924 = vmatprep.subr.bf16.mxu1 %v4707_v3 }
 0x2ae   : > { %v1527_v14 = vpop.permute.xlu1 %1526 }
 0x2af   : > { %v1532_v16 = vsel %vm1404_vm1, %v1527_v14, 0 }
 0x2b2   : > { %v1524_v17 = vpop.permute.xlu1 %1523 }
 0x317   : > { %v1445_v53 = vpop.f32.mrb[4].mxu1 }
 0x318   : > { %v1446_v54 = vadd.f32 %v5463_v52, %v1445_v53  ;;  %v3916_v55 = vpop.f32.mrb[5].mxu1 }
 0x319   : > { %v1448_v56 = vpop.f32.mrb[6].mxu1 }
 0x31a   : > { %v1449_v57 = vadd.f32 %v5463_v52, %v1448_v56  ;;  %v3917_v58 = vpop.f32.mrb[7].mxu1  ;;  %v1452_v59 = vsel %vm1404_vm1, %v1446_v54, -inf }
 0x31b   : > { %1453 = vmax.xlane.f32.xlu0 %v1452_v59 }
 0x31c   : > { %v1455_v60 = vsel %vm1404_vm1, %v1449_v57, -inf }
 0x31f   : > { %1456 = vmax.xlane.f32.xlu0 %v1455_v60 }
 0x3a8   : > { %v1454_v6 = vpop.xlane.xlu0 %1453 }
 0x3a9   : > { %v1458_v7 = vsub.f32 %v1446_v54, %v1454_v6 }
 0x3ab   : > { %v1460_v8 = vmul.f32 1.442695, %v1458_v7 }
 0x3ac   : > { %v1457_v9 = vpop.xlane.xlu0 %1456 }
 0x3ad   : > { %v1459_v10 = vsub.f32 %v1449_v57, %v1457_v9  ;;  %4276 = vpow2.f32 %v1460_v8 }
 0x3af   : > { %v1462_v11 = vmul.f32 1.442695, %v1459_v10 }
 0x3b1   : > { %4278 = vpow2.f32 %v1462_v11 }
 0x3b7   : > { %v4277_v12 = vpop.eup %4276 }
 0x3b8   : > { %v1464_v45 = vsel %vm1404_vm1, %v4277_v12, 0.0 }
 0x3bb   : > { %v4279_v13 = vpop.eup %4278 }
 0x3bc   : > { %v1470_v15 = vpack.c.bf16 %v4279_v13, %v4277_v12  ;;  %v1467_v43 = vsel %vm1404_vm1, %v4279_v13, 0.0 }
 0x3be   : > { %3921 = vmatmul.mubr.msk.bf16.vlgmr.msra.gmra.mrb[8].mxu1 %vm1404_vm1, %v1470_v15 }
 0x3bf   : > { %3925 = vmatpush3.bf16.xpose.msra.mxu1 %v1532_v16  ;;  %3926 = vmatprep.mubr.msk.bf16.mxu1 %vm4708_vm0, %v4707_v3 }
 0x3c0   : > { %3930 = vmatprep.subr.bf16.mxu1 %v4707_v3 }
 0x3c6   : > { %3927 = vmatmul.mubr.msk.bf16.vlgmr.msra.gmra.mrb[12].mxu1 %vm1404_vm1, %v1524_v17 }
 0x3c7   : > { %3932 = vmatprep.mubr.msk.bf16.mxu1 %vm4708_vm0, %v4707_v3 }
 0x491   : > { %v5486_v18 = vpop.f32.mrb[8].mxu1 }
 0x492   : > { %v3922_v19 = vpop.f32.mrb[9].mxu1 }
 0x493   : > { %v1511_v20 = vpop.f32.mrb[10].mxu1 }
 0x494   : > { %v3923_v21 = vpop.f32.mrb[11].mxu1 }
 0x499   : > { %v1568_v22 = vpop.f32.mrb[12].mxu1 }
 0x49a   : > { %v1569_v23 = vadd.f32 %v5463_v52, %v1568_v22  ;;  %v3928_v24 = vpop.f32.mrb[13].mxu1 }
 0x49b   : > { %v1571_v25 = vpop.f32.mrb[14].mxu1 }
 0x49c   : > { %v1572_v26 = vadd.f32 %v5463_v52, %v1571_v25  ;;  %v3929_v27 = vpop.f32.mrb[15].mxu1  ;;  %v1575_v28 = vsel %vm1404_vm1, %v1569_v23, -inf }
 0x49d   : > { %1576 = vmax.xlane.f32.xlu0 %v1575_v28 }
 0x49e   : > { %v1578_v29 = vsel %vm1404_vm1, %v1572_v26, -inf }
 0x49f   : > { %1579 = vmax.xlane.f32.xlu1 %v1578_v29 }
 0x4b3   : > { %1595 = vrot.lane.b32.xlu0 %v5474_v5, %s4709_s20  ;;  %s5998_s20 = sld [smem:[#allocation40_spill]] }
 0x52a   : > { %v1577_v30 = vpop.xlane.xlu0 %1576 }
 0x52b   : > { %v1581_v31 = vsub.f32 %v1569_v23, %v1577_v30 }
 0x52c   : > { %v1580_v32 = vpop.xlane.xlu1 %1579 }
 0x52d   : > { %v1583_v33 = vmul.f32 1.442695, %v1581_v31  ;;  %v1582_v34 = vsub.f32 %v1572_v26, %v1580_v32 }
 0x52e   : > { %v1596_v35 = vpop.permute.xlu0 %1595 }
 0x52f   : > { %4280 = vpow2.f32 %v1583_v33  ;;  %v1585_v36 = vmul.f32 1.442695, %v1582_v34  ;;  %3931 = vmatpush3.bf16.msra.mxu1 %v1596_v35 }
 0x530   : > { %3942 = vmatprep.subr.bf16.mxu1 %v4707_v3 }
 0x531   : > { %4282 = vpow2.f32 %v1585_v36 }
 0x539   : > { %v4281_v37 = vpop.eup %4280 }
 0x53a   : > { %v1587_v38 = vsel %vm1404_vm1, %v4281_v37, 0.0 }
 0x53b   : > { %v4283_v39 = vpop.eup %4282  ;;  %1588 = vadd.xlane.f32.xlu0 %v1587_v38 }
 0x53c   : > { %v1590_v40 = vsel %vm1404_vm1, %v4283_v39, 0.0  ;;  %v1593_v42 = vpack.c.bf16 %v4283_v39, %v4281_v37 }
 0x53d   : > { %1591 = vadd.xlane.f32.xlu1 %v1590_v40 }
 0x53e   : > { %3933 = vmatmul.mubr.msk.bf16.vlgmr.msra.gmra.mrb[16].mxu1 %vm1404_vm1, %v1593_v42  ;;  %v4230_v42 = vld [vmem:[%s5995_s28 + $0x10] sm:$0xff]  }
 0x53f   : > { %3944 = vmatprep.mubr.msk.bf16.mxu1 %vm4708_vm0, %v4707_v3  ;;  %3943 = vmatpush3.bf16.msra.mxu1 %v4228_v46 }
 0x540   : > { %3954 = vmatprep.subr.bf16.mxu1 %v4707_v3 }
 0x54e   : > { %1752 = vrot.lane.b32.xlu1 %v5428_v41, %s4710_s12 }
 0x551   : > { %1750 = vrot.lane.b32.xlu0 %v5432_v44, %s4710_s12 }
 0x570   : > { %1468 = vadd.xlane.f32.xlu0 %v1467_v43 }
 0x572   : > { %1465 = vadd.xlane.f32.xlu1 %v1464_v45 }
 0x586   : > { %1929 = vrot.lane.b32.xlu0 %v5428_v41, %s4711_s14 }
 0x5c8   : > { %v1589_v48 = vpop.xlane.xlu0 %1588 }
 0x5ca   : > { %v1592_v49 = vpop.xlane.xlu1 %1591 }
 0x5cc   : > { %v1751_v50 = vpop.permute.xlu0 %1750 }
 0x5ce   : > { %v1753_v51 = vpop.permute.xlu1 %1752 }
 0x5cf   : > { %v1758_v7 = vsel %vm1404_vm1, %v1753_v51, 0 }
 0x5fd   : > { %v1469_v53 = vpop.xlane.xlu0 %1468 }
 0x5fe   : > { %4284 = vrcp.f32 %v1469_v53 }
 0x5ff   : > { %v1466_v54 = vpop.xlane.xlu1 %1465 }
 0x600   : > { %4286 = vrcp.f32 %v1466_v54 }
 0x601   : > { %4288 = vrcp.f32 %v1589_v48  ;;  %v1930_v36 = vpop.permute.xlu0 %1929 }
 0x602   : > { %4290 = vrcp.f32 %v1592_v49  ;;  %v1935_v39 = vsel %vm1404_vm1, %v1930_v36, 0 }
 0x608   : > { %v4285_v55 = vpop.eup %4284 }
 0x609   : > { %v1518_v57 = vmul.f32 %v4285_v55, %v1511_v20 }
 0x60a   : > { %v4287_v56 = vpop.eup %4286 }
 0x60b   : > { %v1517_v58 = vmul.f32 %v4287_v56, %v5486_v18  ;;  %v4289_v61 = vpop.eup %4288 }
 0x60c   : > { %v4291_v63 = vpop.eup %4290 }
 0x60d   : > { %v1519_v59 = vpack.c.bf16 %v1518_v57, %v1517_v58 }
 0x60f   : > { %3945 = vmatmul.mubr.msk.bf16.vlgmr.msra.gmra.mrb[20].mxu1 %vm1404_vm1, %v1519_v59 }
 0x610   : > { %3956 = vmatprep.mubr.msk.bf16.mxu1 %vm4708_vm0, %v4707_v3 }
 0x611   : > { %v1635_v60 = vpop.f32.mrb[16].mxu1 }
 0x612   : > { %v3934_v62 = vpop.f32.mrb[17].mxu1  ;;  %v1644_v1 = vmul.f32 %v4289_v61, %v1635_v60 }
 0x613   : > { %v1638_v0 = vpop.f32.mrb[18].mxu1 }
 0x614   : > { %v1645_v2 = vmul.f32 %v4291_v63, %v1638_v0  ;;  %v3935_v4 = vpop.f32.mrb[19].mxu1 }
 0x616   : > { %v1646_v6 = vpack.c.bf16 %v1645_v2, %v1644_v1 }
 0x618   : > { %3939 = vmatmul.mubr.msk.bf16.vlgmr.msra.gmra.mrb[8].mxu0 %vm1404_vm1, %v1646_v6 }
 0x619   : > { %3949 = vmatpush3.bf16.xpose.msra.mxu0 %v1758_v7  ;;  %3950 = vmatprep.mubr.msk.bf16.mxu0 %vm4708_vm0, %v4707_v3 }
 0x61a   : > { %3960 = vmatprep.subr.bf16.mxu0 %v4707_v3 }
 0x620   : > { %3951 = vmatmul.mubr.msk.bf16.vlgmr.msra.gmra.mrb[12].mxu0 %vm1404_vm1, %v1751_v50 }
 0x621   : > { %3962 = vmatprep.mubr.msk.bf16.mxu0 %vm4708_vm0, %v4707_v3  ;;  %3961 = vmatpush3.bf16.msra.mxu0 %v4230_v42 }
 0x622   : > { %3972 = vmatprep.subr.bf16.mxu0 %v4707_v3 }
 0x6e2   : > { %v1743_v8 = vpop.f32.mrb[20].mxu1 }
 0x6e3   : > { %v3946_v9 = vpop.f32.mrb[21].mxu1 }
 0x6e4   : > { %v1746_v10 = vpop.f32.mrb[22].mxu1 }
 0x6e5   : > { %v3947_v11 = vpop.f32.mrb[23].mxu1 }
 0x6eb   : > { %v1693_v12 = vpop.f32.mrb[8].mxu0 }
 0x6ec   : > { %v5524_v13 = vadd.f32 %v1743_v8, %v1693_v12  ;;  %v3940_v14 = vpop.f32.mrb[9].mxu0 }
 0x6ed   : > { %v1696_v15 = vpop.f32.mrb[10].mxu0 }
 0x6ee   : > { %v5526_v16 = vadd.f32 %v1746_v10, %v1696_v15  ;;  %v3941_v17 = vpop.f32.mrb[11].mxu0 }
 0x6f3   : > { %v1794_v18 = vpop.f32.mrb[12].mxu0 }
 0x6f4   : > { %v1795_v19 = vadd.f32 %v5463_v52, %v1794_v18  ;;  %v3952_v20 = vpop.f32.mrb[13].mxu0 }
 0x6f5   : > { %v1797_v21 = vpop.f32.mrb[14].mxu0 }
 0x6f6   : > { %v1798_v22 = vadd.f32 %v5463_v52, %v1797_v21  ;;  %v3953_v23 = vpop.f32.mrb[15].mxu0  ;;  %v1801_v24 = vsel %vm1404_vm1, %v1795_v19, -inf }
 0x6f7   : > { %1802 = vmax.xlane.f32.xlu1 %v1801_v24 }
 0x6f8   : > { %v1804_v25 = vsel %vm1404_vm1, %v1798_v22, -inf }
 0x6fb   : > { %1805 = vmax.xlane.f32.xlu1 %v1804_v25  ;;  %v4231_v25 = vld [vmem:[%s5995_s28 + $0x18] sm:$0xff]  }
 0x70c   : > { %1820 = vrot.lane.b32.xlu1 %v5474_v5, %s4710_s12 }
 0x710   : > { %1927 = vrot.lane.b32.xlu1 %v5432_v44, %s4711_s14 }
 0x784   : > { %v1803_v26 = vpop.xlane.xlu1 %1802 }
 0x785   : > { %v1807_v27 = vsub.f32 %v1795_v19, %v1803_v26 }
 0x787   : > { %v1809_v28 = vmul.f32 1.442695, %v1807_v27 }
 0x788   : > { %v1806_v29 = vpop.xlane.xlu1 %1805 }
 0x789   : > { %4292 = vpow2.f32 %v1809_v28  ;;  %v1808_v30 = vsub.f32 %v1798_v22, %v1806_v29 }
 0x78b   : > { %v1811_v31 = vmul.f32 1.442695, %v1808_v30 }
 0x78c   : > { %v1821_v32 = vpop.permute.xlu1 %1820 }
 0x78d   : > { %4294 = vpow2.f32 %v1811_v31  ;;  %3955 = vmatpush3.bf16.msra.mxu1 %v1821_v32 }
 0x78e   : > { %3966 = vmatprep.subr.bf16.mxu1 %v4707_v3 }
 0x790   : > { %v1928_v40 = vpop.permute.xlu1 %1927 }
 0x793   : > { %v4293_v33 = vpop.eup %4292 }
 0x794   : > { %v1813_v34 = vsel %vm1404_vm1, %v4293_v33, 0.0 }
 0x795   : > { %1814 = vadd.xlane.f32.xlu1 %v1813_v34 }
 0x797   : > { %v4295_v35 = vpop.eup %4294 }
 0x798   : > { %v1816_v37 = vsel %vm1404_vm1, %v4295_v35, 0.0  ;;  %v1819_v38 = vpack.c.bf16 %v4295_v35, %v4293_v33 }
 0x799   : > { %1817 = vadd.xlane.f32.xlu0 %v1816_v37 }
 0x79a   : > { %3957 = vmatmul.mubr.msk.bf16.vlgmr.msra.gmra.mrb[24].mxu1 %vm1404_vm1, %v1819_v38 }
 0x79b   : > { %3967 = vmatpush3.bf16.xpose.msra.mxu1 %v1935_v39  ;;  %3968 = vmatprep.mubr.msk.bf16.mxu1 %vm4708_vm0, %v4707_v3 }
 0x79c   : > { %3978 = vmatprep.subr.bf16.mxu1 %v4707_v3 }
 0x7a2   : > { %3969 = vmatmul.mubr.msk.bf16.vlgmr.msra.gmra.mrb[28].mxu1 %vm1404_vm1, %v1928_v40 }
 0x7a3   : > { %3980 = vmatprep.mubr.msk.bf16.mxu1 %vm4708_vm0, %v4707_v3  ;;  %3979 = vmatpush3.bf16.msra.mxu1 %v4231_v25 }
 0x7a4   : > { %3990 = vmatprep.subr.bf16.mxu1 %v4707_v3 }
 0x7af   : > { %1997 = vrot.lane.b32.xlu0 %v5474_v5, %s4711_s14  ;;  %s6005_s14 = sld [smem:[#allocation36_spill]] }
 0x7b5   : > { %p6007_p5 = scmp.ne.s32.totalorder %s6005_s14, 0 }
 0x822   : > { %v1815_v43 = vpop.xlane.xlu1 %1814 }
 0x823   : > { %4296 = vrcp.f32 %v1815_v43 }
 0x826   : > { %v1818_v45 = vpop.xlane.xlu0 %1817 }
 0x827   : > { %4298 = vrcp.f32 %v1818_v45 }
 0x82a   : > { %v1998_v56 = vpop.permute.xlu0 %1997 }
 0x82d   : > { %v4297_v47 = vpop.eup %4296 }
 0x831   : > { %v4299_v49 = vpop.eup %4298 }
 0x86d   : > { %v1860_v46 = vpop.f32.mrb[24].mxu1 }
 0x86e   : > { %v3958_v48 = vpop.f32.mrb[25].mxu1  ;;  %v1869_v51 = vmul.f32 %v4297_v47, %v1860_v46 }
 0x86f   : > { %v1863_v50 = vpop.f32.mrb[26].mxu1 }
 0x870   : > { %v1870_v53 = vmul.f32 %v4299_v49, %v1863_v50  ;;  %v3959_v54 = vpop.f32.mrb[27].mxu1 }
 0x872   : > { %v1871_v55 = vpack.c.bf16 %v1870_v53, %v1869_v51 }
 0x874   : > { %3963 = vmatmul.mubr.msk.bf16.vlgmr.msra.gmra.mrb[16].mxu0 %vm1404_vm1, %v1871_v55 }
 0x875   : > { %3973 = vmatpush3.bf16.msra.mxu0 %v1998_v56  ;;  %v1971_v57 = vpop.f32.mrb[28].mxu1  ;;  %3974 = vmatprep.mubr.msk.bf16.mxu0 %vm4708_vm0, %v4707_v3 }
 0x876   : > { %v1972_v58 = vadd.f32 %v5463_v52, %v1971_v57  ;;  %v3970_v59 = vpop.f32.mrb[29].mxu1  ;;  %3984 = vmatprep.subr.bf16.mxu0 %v4707_v3 }
 0x877   : > { %v1974_v60 = vpop.f32.mrb[30].mxu1 }
 0x878   : > { %v1975_v61 = vadd.f32 %v5463_v52, %v1974_v60  ;;  %v3971_v62 = vpop.f32.mrb[31].mxu1  ;;  %v1978_v63 = vsel %vm1404_vm1, %v1972_v58, -inf }
 0x879   : > { %1979 = vmax.xlane.f32.xlu1 %v1978_v63 }
 0x87a   : > { %v1981_v0 = vsel %vm1404_vm1, %v1975_v61, -inf }
 0x87d   : > { %1982 = vmax.xlane.f32.xlu1 %v1981_v0 }
 0x88e   : > { %2106 = vrot.lane.b32.xlu1 %v5428_v41, %s4712_s25 }
 0x892   : > { %2104 = vrot.lane.b32.xlu1 %v5432_v44, %s4712_s25 }
 0x906   : > { %v1980_v1 = vpop.xlane.xlu1 %1979 }
 0x907   : > { %v1984_v2 = vsub.f32 %v1972_v58, %v1980_v1 }
 0x909   : > { %v1986_v4 = vmul.f32 1.442695, %v1984_v2 }
 0x90a   : > { %v1983_v6 = vpop.xlane.xlu1 %1982 }
 0x90b   : > { %4300 = vpow2.f32 %v1986_v4  ;;  %v1985_v7 = vsub.f32 %v1975_v61, %v1983_v6  ;;  %v4232_v4 = vld [vmem:[%s5995_s28 + $0x20] sm:$0xff]  }
 0x90d   : > { %v1988_v8 = vmul.f32 1.442695, %v1985_v7 }
 0x90e   : > { %v2107_v12 = vpop.permute.xlu1 %2106 }
 0x90f   : > { %4302 = vpow2.f32 %v1988_v8  ;;  %v2112_v17 = vsel %vm1404_vm1, %v2107_v12, 0 }
 0x912   : > { %v2105_v18 = vpop.permute.xlu1 %2104 }
 0x915   : > { %v4301_v9 = vpop.eup %4300 }
 0x916   : > { %v1990_v10 = vsel %vm1404_vm1, %v4301_v9, 0.0 }
 0x917   : > { %1991 = vadd.xlane.f32.xlu0 %v1990_v10 }
 0x919   : > { %v4303_v11 = vpop.eup %4302 }
 0x91a   : > { %v1993_v14 = vsel %vm1404_vm1, %v4303_v11, 0.0  ;;  %v1996_v15 = vpack.c.bf16 %v4303_v11, %v4301_v9 }
 0x91b   : > { %1994 = vadd.xlane.f32.xlu1 %v1993_v14 }
 0x91c   : > { %3975 = vmatmul.mubr.msk.bf16.vlgmr.msra.gmra.mrb[20].mxu0 %vm1404_vm1, %v1996_v15 }
 0x91d   : > { %3985 = vmatpush3.bf16.xpose.msra.mxu0 %v2112_v17  ;;  %3986 = vmatprep.mubr.msk.bf16.mxu0 %vm4708_vm0, %v4707_v3 }
 0x91e   : > { %3996 = vmatprep.subr.bf16.mxu0 %v4707_v3 }
 0x924   : > { %3987 = vmatmul.mubr.msk.bf16.vlgmr.msra.gmra.mrb[24].mxu0 %vm1404_vm1, %v2105_v18 }
 0x925   : > { %3998 = vmatprep.mubr.msk.bf16.mxu0 %vm4708_vm0, %v4707_v3  ;;  %3997 = vmatpush3.bf16.msra.mxu0 %v4232_v4 }
 0x926   : > { %4008 = vmatprep.subr.bf16.mxu0 %v4707_v3 }
 0x92c   : > { %2174 = vrot.lane.b32.xlu1 %v5474_v5, %s4712_s25 }
 0x930   : > { %2281 = vrot.lane.b32.xlu1 %v5432_v44, %s4713_s0 }
 0x947   : > { %v1918_v19 = vpop.f32.mrb[16].mxu0 }
 0x948   : > { %v1925_v20 = vadd.f32 %v1918_v19, %v5524_v13  ;;  %v3964_v21 = vpop.f32.mrb[17].mxu0 }
 0x949   : > { %v1921_v22 = vpop.f32.mrb[18].mxu0 }
 0x94a   : > { %v1926_v23 = vadd.f32 %v1921_v22, %v5526_v16  ;;  %v3965_v24 = vpop.f32.mrb[19].mxu0 }
 0x9a4   : > { %v1992_v26 = vpop.xlane.xlu0 %1991 }
 0x9a5   : > { %4304 = vrcp.f32 %v1992_v26 }
 0x9a8   : > { %v1995_v27 = vpop.xlane.xlu1 %1994 }
 0x9a9   : > { %4306 = vrcp.f32 %v1995_v27 }
 0x9ac   : > { %v2175_v36 = vpop.permute.xlu1 %2174 }
 0x9af   : > { %v4305_v29 = vpop.eup %4304 }
 0x9b0   : > { %v2282_v60 = vpop.permute.xlu1 %2281 }
 0x9b3   : > { %v4307_v31 = vpop.eup %4306 }
 0x9ef   : > { %v2037_v28 = vpop.f32.mrb[20].mxu0 }
 0x9f0   : > { %v3976_v30 = vpop.f32.mrb[21].mxu0  ;;  %v2046_v33 = vmul.f32 %v4305_v29, %v2037_v28 }
 0x9f1   : > { %v2040_v32 = vpop.f32.mrb[22].mxu0 }
 0x9f2   : > { %v2047_v13 = vmul.f32 %v4307_v31, %v2040_v32  ;;  %v3977_v34 = vpop.f32.mrb[23].mxu0 }
 0x9f4   : > { %v2048_v35 = vpack.c.bf16 %v2047_v13, %v2046_v33 }
 0x9f6   : > { %3981 = vmatmul.mubr.msk.bf16.vlgmr.msra.gmra.mrb[32].mxu1 %vm1404_vm1, %v2048_v35 }
 0x9f7   : > { %3991 = vmatpush3.bf16.msra.mxu1 %v2175_v36  ;;  %v2148_v16 = vpop.f32.mrb[24].mxu0  ;;  %3992 = vmatprep.mubr.msk.bf16.mxu1 %vm4708_vm0, %v4707_v3 }
 0x9f8   : > { %v2149_v37 = vadd.f32 %v5463_v52, %v2148_v16  ;;  %v3988_v38 = vpop.f32.mrb[25].mxu0  ;;  %4002 = vmatprep.subr.bf16.mxu1 %v4707_v3 }
 0x9f9   : > { %v2151_v39 = vpop.f32.mrb[26].mxu0 }
 0x9fa   : > { %v2152_v40 = vadd.f32 %v5463_v52, %v2151_v39  ;;  %v3989_v42 = vpop.f32.mrb[27].mxu0  ;;  %v2155_v43 = vsel %vm1404_vm1, %v2149_v37, -inf }
 0x9fb   : > { %2156 = vmax.xlane.f32.xlu0 %v2155_v43 }
 0x9fc   : > { %v2158_v45 = vsel %vm1404_vm1, %v2152_v40, -inf }
 0x9ff   : > { %2159 = vmax.xlane.f32.xlu0 %v2158_v45 }
 0xa15   : > { %2283 = vrot.lane.b32.xlu0 %v5428_v41, %s4713_s0 }
 0xa88   : > { %v2157_v46 = vpop.xlane.xlu0 %2156 }
 0xa89   : > { %v2161_v47 = vsub.f32 %v2149_v37, %v2157_v46 }
 0xa8b   : > { %v2163_v48 = vmul.f32 1.442695, %v2161_v47 }
 0xa8c   : > { %v2160_v49 = vpop.xlane.xlu0 %2159 }
 0xa8d   : > { %4308 = vpow2.f32 %v2163_v48  ;;  %v2162_v50 = vsub.f32 %v2152_v40, %v2160_v49  ;;  %v4233_v48 = vld [vmem:[%s5995_s28 + $0x28] sm:$0xff]  }
 0xa8f   : > { %v2165_v51 = vmul.f32 1.442695, %v2162_v50 }
 0xa90   : > { %v2284_v56 = vpop.permute.xlu0 %2283 }
 0xa91   : > { %4310 = vpow2.f32 %v2165_v51  ;;  %v2289_v59 = vsel %vm1404_vm1, %v2284_v56, 0 }
 0xa97   : > { %v4309_v53 = vpop.eup %4308 }
 0xa98   : > { %v2167_v54 = vsel %vm1404_vm1, %v4309_v53, 0.0 }
 0xa99   : > { %2168 = vadd.xlane.f32.xlu1 %v2167_v54 }
 0xa9b   : > { %v4311_v55 = vpop.eup %4310 }
 0xa9c   : > { %v2170_v57 = vsel %vm1404_vm1, %v4311_v55, 0.0  ;;  %v2173_v58 = vpack.c.bf16 %v4311_v55, %v4309_v53 }
 0xa9d   : > { %2171 = vadd.xlane.f32.xlu0 %v2170_v57 }
 0xa9e   : > { %3993 = vmatmul.mubr.msk.bf16.vlgmr.msra.gmra.mrb[36].mxu1 %vm1404_vm1, %v2173_v58 }
 0xa9f   : > { %4003 = vmatpush3.bf16.xpose.msra.mxu1 %v2289_v59  ;;  %4004 = vmatprep.mubr.msk.bf16.mxu1 %vm4708_vm0, %v4707_v3 }
 0xaa0   : > { %4014 = vmatprep.subr.bf16.mxu1 %v4707_v3 }
 0xaa6   : > { %4005 = vmatmul.mubr.msk.bf16.vlgmr.msra.gmra.mrb[40].mxu1 %vm1404_vm1, %v2282_v60 }
 0xaa7   : > { %4016 = vmatprep.mubr.msk.bf16.mxu1 %vm4708_vm0, %v4707_v3  ;;  %4015 = vmatpush3.bf16.msra.mxu1 %v4233_v48 }
 0xaa8   : > { %4026 = vmatprep.subr.bf16.mxu1 %v4707_v3 }
 0xac9   : > { %v2095_v61 = vpop.f32.mrb[32].mxu1 }
 0xaca   : > { %v5598_v62 = vadd.f32 %v2095_v61, %v1925_v20  ;;  %v3982_v63 = vpop.f32.mrb[33].mxu1 }
 0xacb   : > { %v2098_v0 = vpop.f32.mrb[34].mxu1 }
 0xacc   : > { %v5600_v1 = vadd.f32 %v2098_v0, %v1926_v23  ;;  %v3983_v2 = vpop.f32.mrb[35].mxu1 }
 0xb26   : > { %v2169_v6 = vpop.xlane.xlu1 %2168 }
 0xb27   : > { %4312 = vrcp.f32 %v2169_v6 }
 0xb2a   : > { %v2172_v7 = vpop.xlane.xlu0 %2171 }
 0xb2b   : > { %4314 = vrcp.f32 %v2172_v7 }
 0xb31   : > { %v4313_v9 = vpop.eup %4312 }
 0xb35   : > { %v4315_v11 = vpop.eup %4314 }
 0xb71   : > { %v2214_v8 = vpop.f32.mrb[36].mxu1 }
 0xb72   : > { %v3994_v10 = vpop.f32.mrb[37].mxu1  ;;  %v2223_v14 = vmul.f32 %v4313_v9, %v2214_v8 }
 0xb73   : > { %v2217_v12 = vpop.f32.mrb[38].mxu1 }
 0xb74   : > { %v2224_v15 = vmul.f32 %v4315_v11, %v2217_v12  ;;  %v3995_v17 = vpop.f32.mrb[39].mxu1 }
 0xb76   : > { %v2225_v18 = vpack.c.bf16 %v2224_v15, %v2223_v14 }
 0xb78   : > { %3999 = vmatmul.mubr.msk.bf16.vlgmr.msra.gmra.mrb[28].mxu0 %vm1404_vm1, %v2225_v18 }
 0xb79   : > { %v2325_v19 = vpop.f32.mrb[40].mxu1  ;;  %4010 = vmatprep.mubr.msk.bf16.mxu0 %vm4708_vm0, %v4707_v3 }
 0xb7a   : > { %v2326_v20 = vadd.f32 %v5463_v52, %v2325_v19  ;;  %v4006_v21 = vpop.f32.mrb[41].mxu1 }
 0xb7b   : > { %v2328_v22 = vpop.f32.mrb[42].mxu1 }
 0xb7c   : > { %v2329_v23 = vadd.f32 %v5463_v52, %v2328_v22  ;;  %v4007_v24 = vpop.f32.mrb[43].mxu1  ;;  %v2332_v25 = vsel %vm1404_vm1, %v2326_v20, -inf }
 0xb7d   : > { %2333 = vmax.xlane.f32.xlu0 %v2332_v25 }
 0xb7e   : > { %v2335_v26 = vsel %vm1404_vm1, %v2329_v23, -inf }
 0xb7f   : > { %2336 = vmax.xlane.f32.xlu1 %v2335_v26 }
 0xb90   : > { %2460 = vrot.lane.b32.xlu1 %v5428_v41, %s4714_s22 }
 0xb93   : > { %2351 = vrot.lane.b32.xlu0 %v5474_v5, %s4713_s0  ;;  %s3264_s0 = sshll.u32 %s5354_s29, 4  ;;  %s5757_s0 = int_to_ptr.vmem [resolvable:$true] %s3264_s0 }
 0xb94   : > { %2458 = vrot.lane.b32.xlu1 %v5432_v44, %s4714_s22  ;;  %p4567_p9 = scmp.lt.s32.totalorder %s5757_s0, %s4565_s26 }
 0xc0a   : > { %v2334_v27 = vpop.xlane.xlu0 %2333 }
 0xc0b   : > { %v2338_v28 = vsub.f32 %v2326_v20, %v2334_v27 }
 0xc0c   : > { %v2337_v29 = vpop.xlane.xlu1 %2336 }
 0xc0d   : > { %v2340_v30 = vmul.f32 1.442695, %v2338_v28  ;;  %v2339_v31 = vsub.f32 %v2329_v23, %v2337_v29  ;;  %v4234_v28 = vld [vmem:[%s5995_s28 + $0x30] sm:$0xff]  }
 0xc0e   : > { %v2352_v32 = vpop.permute.xlu0 %2351 }
 0xc0f   : > { %4316 = vpow2.f32 %v2340_v30  ;;  %v2342_v33 = vmul.f32 1.442695, %v2339_v31  ;;  %4009 = vmatpush3.bf16.msra.mxu0 %v2352_v32 }
 0xc10   : > { %4020 = vmatprep.subr.bf16.mxu0 %v4707_v3  ;;  %v2461_v36 = vpop.permute.xlu1 %2460 }
 0xc11   : > { %4318 = vpow2.f32 %v2342_v33  ;;  %v2466_v38 = vsel %vm1404_vm1, %v2461_v36, 0 }
 0xc14   : > { %v2459_v39 = vpop.permute.xlu1 %2458 }
 0xc19   : > { %v4317_v13 = vpop.eup %4316 }
 0xc1a   : > { %v2344_v34 = vsel %vm1404_vm1, %v4317_v13, 0.0 }
 0xc1b   : > { %v4319_v35 = vpop.eup %4318  ;;  %2345 = vadd.xlane.f32.xlu0 %v2344_v34 }
 0xc1c   : > { %v2347_v16 = vsel %vm1404_vm1, %v4319_v35, 0.0  ;;  %v2350_v37 = vpack.c.bf16 %v4319_v35, %v4317_v13 }
 0xc1d   : > { %2348 = vadd.xlane.f32.xlu1 %v2347_v16 }
 0xc1e   : > { %4011 = vmatmul.mubr.msk.bf16.vlgmr.msra.gmra.mrb[32].mxu0 %vm1404_vm1, %v2350_v37 }
 0xc1f   : > { %4021 = vmatpush3.bf16.xpose.msra.mxu0 %v2466_v38  ;;  %4022 = vmatprep.mubr.msk.bf16.mxu0 %vm4708_vm0, %v4707_v3 }
 0xc20   : > { %4032 = vmatprep.subr.bf16.mxu0 %v4707_v3 }
 0xc26   : > { %4023 = vmatmul.mubr.msk.bf16.vlgmr.msra.gmra.mrb[36].mxu0 %vm1404_vm1, %v2459_v39 }
 0xc27   : > { %4034 = vmatprep.mubr.msk.bf16.mxu0 %vm4708_vm0, %v4707_v3  ;;  %4033 = vmatpush3.bf16.msra.mxu0 %v4234_v28 }
 0xc28   : > { %4044 = vmatprep.subr.bf16.mxu0 %v4707_v3 }
 0xc2e   : > { %2528 = vrot.lane.b32.xlu1 %v5474_v5, %s4714_s22 }
 0xc32   : > { %2635 = vrot.lane.b32.xlu1 %v5432_v44, %s4715_s15 }
 0xc4b   : > { %v2272_v40 = vpop.f32.mrb[28].mxu0 }
 0xc4c   : > { %v2279_v42 = vadd.f32 %v2272_v40, %v5598_v62  ;;  %v4000_v43 = vpop.f32.mrb[29].mxu0 }
 0xc4d   : > { %v2275_v45 = vpop.f32.mrb[30].mxu0 }
 0xc4e   : > { %v2280_v46 = vadd.f32 %v2275_v45, %v5600_v1  ;;  %v4001_v47 = vpop.f32.mrb[31].mxu0 }
 0xca8   : > { %v2346_v49 = vpop.xlane.xlu0 %2345 }
 0xca9   : > { %4320 = vrcp.f32 %v2346_v49 }
 0xcaa   : > { %v2349_v50 = vpop.xlane.xlu1 %2348 }
 0xcab   : > { %4322 = vrcp.f32 %v2349_v50 }
 0xcae   : > { %v2529_v60 = vpop.permute.xlu1 %2528 }
 0xcb2   : > { %v2636_v21 = vpop.permute.xlu1 %2635 }
 0xcb3   : > { %v4321_v53 = vpop.eup %4320 }
 0xcb5   : > { %v4323_v44 = vpop.eup %4322 }
 0xcf1   : > { %v2391_v51 = vpop.f32.mrb[32].mxu0 }
 0xcf2   : > { %v4012_v54 = vpop.f32.mrb[33].mxu0  ;;  %v2400_v56 = vmul.f32 %v4321_v53, %v2391_v51 }
 0xcf3   : > { %v2394_v55 = vpop.f32.mrb[34].mxu0 }
 0xcf4   : > { %v2401_v57 = vmul.f32 %v4323_v44, %v2394_v55  ;;  %v4013_v58 = vpop.f32.mrb[35].mxu0 }
 0xcf6   : > { %v2402_v59 = vpack.c.bf16 %v2401_v57, %v2400_v56 }
 0xcf8   : > { %4017 = vmatmul.mubr.msk.bf16.vlgmr.msra.gmra.mrb[44].mxu1 %vm1404_vm1, %v2402_v59 }
 0xcf9   : > { %4027 = vmatpush3.bf16.msra.mxu1 %v2529_v60  ;;  %v2502_v61 = vpop.f32.mrb[36].mxu0  ;;  %4028 = vmatprep.mubr.msk.bf16.mxu1 %vm4708_vm0, %v4707_v3 }
 0xcfa   : > { %v2503_v62 = vadd.f32 %v5463_v52, %v2502_v61  ;;  %v4024_v63 = vpop.f32.mrb[37].mxu0  ;;  %4038 = vmatprep.subr.bf16.mxu1 %v4707_v3 }
 0xcfb   : > { %v2505_v0 = vpop.f32.mrb[38].mxu0  ;;  %v4235_v63 = vld [vmem:[%s5995_s28 + $0x38] sm:$0xff]  }
 0xcfc   : > { %v2506_v1 = vadd.f32 %v5463_v52, %v2505_v0  ;;  %v4025_v2 = vpop.f32.mrb[39].mxu0  ;;  %v2509_v4 = vsel %vm1404_vm1, %v2503_v62, -inf }
 0xcfd   : > { %2510 = vmax.xlane.f32.xlu0 %v2509_v4 }
 0xcfe   : > { %v2512_v6 = vsel %vm1404_vm1, %v2506_v1, -inf }
 0xd01   : > { %2513 = vmax.xlane.f32.xlu0 %v2512_v6 }
 0xd17   : > { %2637 = vrot.lane.b32.xlu0 %v5428_v41, %s4715_s15 }
 0xd8a   : > { %v2511_v7 = vpop.xlane.xlu0 %2510 }
 0xd8b   : > { %v2515_v8 = vsub.f32 %v2503_v62, %v2511_v7 }
 0xd8d   : > { %v2517_v9 = vmul.f32 1.442695, %v2515_v8 }
 0xd8e   : > { %v2514_v10 = vpop.xlane.xlu0 %2513 }
 0xd8f   : > { %4324 = vpow2.f32 %v2517_v9  ;;  %v2516_v11 = vsub.f32 %v2506_v1, %v2514_v10 }
 0xd91   : > { %v2519_v12 = vmul.f32 1.442695, %v2516_v11 }
 0xd92   : > { %v2638_v18 = vpop.permute.xlu0 %2637 }
 0xd93   : > { %4326 = vpow2.f32 %v2519_v12  ;;  %v2643_v41 = vsel %vm1404_vm1, %v2638_v18, 0 }
 0xd99   : > { %v4325_v14 = vpop.eup %4324 }
 0xd9a   : > { %v2521_v15 = vsel %vm1404_vm1, %v4325_v14, 0.0 }
 0xd9b   : > { %2522 = vadd.xlane.f32.xlu1 %v2521_v15  ;;  %v3703_v15 = vld [vmem:[%s5997_s16] ss:$0 sm:$0xff]  ;;  %s4566_s16 = scalar_lea.vmem %s4565_s26, 512 }
 0xd9d   : > { %v4327_v17 = vpop.eup %4326 }
 0xd9e   : > { %v2524_v19 = vsel %vm1404_vm1, %v4327_v17, 0.0  ;;  %v2527_v20 = vpack.c.bf16 %v4327_v17, %v4325_v14 }
 0xd9f   : > { %2525 = vadd.xlane.f32.xlu0 %v2524_v19 }
 0xda0   : > { %4029 = vmatmul.mubr.msk.bf16.vlgmr.msra.gmra.mrb[48].mxu1 %vm1404_vm1, %v2527_v20 }
 0xda1   : > { %4039 = vmatpush3.bf16.xpose.msra.mxu1 %v2643_v41  ;;  %4040 = vmatprep.mubr.msk.bf16.mxu1 %vm4708_vm0, %v4707_v3 }
 0xda2   : > { %4050 = vmatprep.subr.bf16.mxu1 %v4707_v3 }
 0xda8   : > { %4041 = vmatmul.mubr.msk.bf16.vlgmr.msra.gmra.mrb[52].mxu1 %vm1404_vm1, %v2636_v21 }
 0xda9   : > { %4052 = vmatprep.mubr.msk.bf16.mxu1 %vm4708_vm0, %v4707_v3  ;;  %4051 = vmatpush3.bf16.msra.mxu1 %v4235_v63 }
 0xdcb   : > { %v2449_v22 = vpop.f32.mrb[44].mxu1 }
 0xdcc   : > { %v2456_v23 = vadd.f32 %v2449_v22, %v2279_v42  ;;  %v4018_v24 = vpop.f32.mrb[45].mxu1 }
 0xdcd   : > { %v2452_v25 = vpop.f32.mrb[46].mxu1 }
 0xdce   : > { %v2457_v26 = vadd.f32 %v2452_v25, %v2280_v46  ;;  %v4019_v27 = vpop.f32.mrb[47].mxu1  ;;  %v4349_v25 = vld [vmem:[%s5354_s29 + $0x8] sm:$0xff] }
 0xe28   : > { %v2523_v29 = vpop.xlane.xlu1 %2522 }
 0xe29   : > { %4328 = vrcp.f32 %v2523_v29  ;;  %v4238_v29 = vld [vmem:[%s5998_s20 + $0x4] ss:$8 sps:$4 sm:$0xff]  }
 0xe2c   : > { %v2526_v30 = vpop.xlane.xlu0 %2525 }
 0xe2d   : > { %4330 = vrcp.f32 %v2526_v30  ;;  %v4236_v30 = vld [vmem:[%s5998_s20] ss:$8 sps:$4 sm:$0xff]  }
 0xe33   : > { %v4329_v32 = vpop.eup %4328 }
 0xe37   : > { %v4331_v13 = vpop.eup %4330 }
 0xe73   : > { %v2568_v31 = vpop.f32.mrb[48].mxu1 }
 0xe74   : > { %v4030_v33 = vpop.f32.mrb[49].mxu1  ;;  %v2577_v35 = vmul.f32 %v4329_v32, %v2568_v31  ;;  %v4241_v31 = vld [vmem:[%s5998_s20 + $0x14] ss:$8 sps:$4 sm:$0xff]   ;;  %v4239_v32 = vld [vmem:[%s5998_s20 + $0x10] ss:$8 sps:$4 sm:$0xff]  }
 0xe75   : > { %v2571_v34 = vpop.f32.mrb[50].mxu1  ;;  %v4244_v33 = vld [vmem:[%s5998_s20 + $0x24] ss:$8 sps:$4 sm:$0xff]  }
 0xe76   : > { %v2578_v36 = vmul.f32 %v4331_v13, %v2571_v34  ;;  %v4031_v16 = vpop.f32.mrb[51].mxu1  ;;  %v4242_v13 = vld [vmem:[%s5998_s20 + $0x20] ss:$8 sps:$4 sm:$0xff]   ;;  %v4247_v34 = vld [vmem:[%s5998_s20 + $0x34] ss:$8 sps:$4 sm:$0xff]  }
 0xe77   : > { %v4248_v16 = vld [vmem:[%s5998_s20 + $0x40] ss:$8 sps:$4 sm:$0xff]  }
 0xe78   : > { %v2579_v37 = vpack.c.bf16 %v2578_v36, %v2577_v35  ;;  %v4245_v35 = vld [vmem:[%s5998_s20 + $0x30] ss:$8 sps:$4 sm:$0xff]   ;;  %v4250_v36 = vld [vmem:[%s5998_s20 + $0x44] ss:$8 sps:$4 sm:$0xff]  }
 0xe7a   : > { %4035 = vmatmul.mubr.msk.bf16.vlgmr.msra.gmra.mrb[40].mxu0 %vm1404_vm1, %v2579_v37  ;;  %v4253_v37 = vld [vmem:[%s5998_s20 + $0x54] ss:$8 sps:$4 sm:$0xff]  }
 0xe7b   : > { %v2679_v38 = vpop.f32.mrb[52].mxu1  ;;  %4046 = vmatprep.mubr.msk.bf16.mxu0 %vm4708_vm0, %v4707_v3 }
 0xe7c   : > { %v2680_v39 = vadd.f32 %v5463_v52, %v2679_v38  ;;  %v4042_v40 = vpop.f32.mrb[53].mxu1  ;;  %v4716_v38 = vmov 0  }
 0xe7d   : > { %v2682_v42 = vpop.f32.mrb[54].mxu1  ;;  %v4256_v40 = vld [vmem:[%s5998_s20 + $0x64] ss:$8 sps:$4 sm:$0xff]  }
 0xe7e   : > { %v2683_v43 = vadd.f32 %v5463_v52, %v2682_v42  ;;  %v4043_v45 = vpop.f32.mrb[55].mxu1  ;;  %v2686_v46 = vsel %vm1404_vm1, %v2680_v39, -inf  ;;  %v4254_v42 = vld [vmem:[%s5998_s20 + $0x60] ss:$8 sps:$4 sm:$0xff]  }
 0xe7f   : > { %2687 = vmax.xlane.f32.xlu0 %v2686_v46  ;;  %v4257_v45 = vld [vmem:[%s5998_s20 + $0x70] ss:$8 sps:$4 sm:$0xff]   ;;  %v4260_v46 = vld [vmem:[%s5350_s11 + $0x40] sm:$0xff]  }
 0xe80   : > { %v2689_v47 = vsel %vm1404_vm1, %v2683_v43, -inf  ;;  %3830 = vmatprep.subr.bf16.mxu1 %v4260_v46 }
 0xe81   : > { %2690 = vmax.xlane.f32.xlu1 %v2689_v47  ;;  %v4261_v47 = vld [vmem:[%s5350_s11] sm:$0xff]  }
 0xe95   : > { %2705 = vrot.lane.b32.xlu0 %v5474_v5, %s4715_s15 }
 0xf0c   : > { %v2688_v48 = vpop.xlane.xlu0 %2687 }
 0xf0d   : > { %v2692_v49 = vsub.f32 %v2680_v39, %v2688_v48  ;;  %v4251_v39 = vld [vmem:[%s5998_s20 + $0x50] ss:$8 sps:$4 sm:$0xff]   ;;  %v4262_v48 = vld [vmem:[%s5350_s11 + $0x48] sm:$0xff]  }
 0xf0e   : > { %v2691_v50 = vpop.xlane.xlu1 %2690 }
 0xf0f   : > { %v2694_v3 = vmul.f32 1.442695, %v2692_v49  ;;  %v2693_v51 = vsub.f32 %v2683_v43, %v2691_v50  ;;  %v4259_v43 = vld [vmem:[%s5998_s20 + $0x74] ss:$8 sps:$4 sm:$0xff]   ;;  %v4263_v49 = vld [vmem:[%s5350_s11 + $0x8] sm:$0xff]  }
 0xf10   : > { %v2706_v53 = vpop.permute.xlu0 %2705  ;;  %v4264_v50 = vld [vmem:[%s5350_s11 + $0x50] sm:$0xff]  }
 0xf11   : > { %4332 = vpow2.f32 %v2694_v3  ;;  %v2696_v54 = vmul.f32 1.442695, %v2693_v51  ;;  %4045 = vmatpush3.bf16.msra.mxu0 %v2706_v53  ;;  %v4265_v3 = vld [vmem:[%s5350_s11 + $0x10] sm:$0xff]   ;;  %v4266_v51 = vld [vmem:[%s5350_s11 + $0x58] sm:$0xff]  }
 0xf12   : > { %2977 = vmatprep.subr.bf16.mxu0 %v4238_v29  ;;  %v4267_v53 = vld [vmem:[%s5350_s11 + $0x18] sm:$0xff]  }
 0xf13   : > { %4334 = vpow2.f32 %v2696_v54  ;;  %v4268_v54 = vld [vmem:[%s5350_s11 + $0x60] sm:$0xff]  }
 0xf1b   : > { %v4333_v52 = vpop.eup %4332 }
 0xf1c   : > { %v2698_v44 = vsel %vm1404_vm1, %v4333_v52, 0.0 }
 0xf1d   : > { %v4335_v55 = vpop.eup %4334  ;;  %2699 = vadd.xlane.f32.xlu1 %v2698_v44  ;;  %v4270_v44 = vld [vmem:[%s5350_s11 + $0x68] sm:$0xff]  }
 0xf1e   : > { %v2704_v56 = vpack.c.bf16 %v4335_v55, %v4333_v52  ;;  %v2701_v5 = vsel %vm1404_vm1, %v4335_v55, 0.0  ;;  %v4269_v52 = vld [vmem:[%s5350_s11 + $0x20] sm:$0xff]  }
 0xf20   : > { %4047 = vmatmul.mubr.msk.bf16.vlgmr.msra.gmra.mrb[44].mxu0 %vm1404_vm1, %v2704_v56 }
 0xf21   : > { %2702 = vadd.xlane.f32.xlu1 %v2701_v5  ;;  %2978 = vmatpush1.bf16.msra.mxu0 %v4236_v30 }
 0xf22   : > { %2979 = vmatprep.subr.bf16.mxu0 %v4241_v31  ;;  %3009 = vmatprep.mubr.bf16.mxu0 %v4716_v38 }
 0xf25   : > { %2980 = vmatpush1.bf16.msra.mxu0 %v4239_v32 }
 0xf26   : > { %2981 = vmatprep.subr.bf16.mxu0 %v4244_v33 }
 0xf29   : > { %2982 = vmatpush1.bf16.msra.mxu0 %v4242_v13 }
 0xf2a   : > { %2983 = vmatprep.subr.bf16.mxu0 %v4247_v34 }
 0xf2d   : > { %2984 = vmatpush1.bf16.msra.mxu0 %v4245_v35 }
 0xf2e   : > { %2985 = vmatprep.subr.bf16.mxu0 %v4250_v36 }
 0xf31   : > { %2986 = vmatpush1.bf16.msra.mxu0 %v4248_v16 }
 0xf32   : > { %2987 = vmatprep.subr.bf16.mxu0 %v4253_v37 }
 0xf35   : > { %2988 = vmatpush1.bf16.msra.mxu0 %v4251_v39 }
 0xf36   : > { %2989 = vmatprep.subr.bf16.mxu0 %v4256_v40 }
 0xf39   : > { %2990 = vmatpush1.bf16.msra.mxu0 %v4254_v42 }
 0xf3a   : > { %2991 = vmatprep.subr.bf16.mxu0 %v4259_v43 }
 0xf3d   : > { %2992 = vmatpush1.bf16.msra.mxu0 %v4257_v45 }
 0xf4d   : > { %v2626_v57 = vpop.f32.mrb[40].mxu0 }
 0xf4e   : > { %v2633_v58 = vadd.f32 %v2626_v57, %v2456_v23  ;;  %v4036_v59 = vpop.f32.mrb[41].mxu0  ;;  %v4348_v23 = vld [vmem:[%s5354_s29] sm:$0xff] }
 0xf4f   : > { %v2629_v60 = vpop.f32.mrb[42].mxu0 }
 0xf50   : > { %v2634_v61 = vadd.f32 %v2629_v60, %v2457_v26  ;;  %v4037_v62 = vpop.f32.mrb[43].mxu0 }
 0xfaa   : > { %v2700_v0 = vpop.xlane.xlu1 %2699 }
 0xfab   : > { %4336 = vrcp.f32 %v2700_v0 }
 0xfae   : > { %v2703_v1 = vpop.xlane.xlu1 %2702 }
 0xfaf   : > { %4338 = vrcp.f32 %v2703_v1 }
 0xfb5   : > { %v4337_v4 = vpop.eup %4336 }
 0xfb9   : > { %v4339_v7 = vpop.eup %4338 }
 0xff3   : > { %v2745_v2 = vpop.f32.mrb[44].mxu0 }
 0xff4   : > { %v4048_v6 = vpop.f32.mrb[45].mxu0  ;;  %v2754_v9 = vmul.f32 %v4337_v4, %v2745_v2 }
 0xff5   : > { %v2748_v8 = vpop.f32.mrb[46].mxu0 }
 0xff6   : > { %v2755_v10 = vmul.f32 %v4339_v7, %v2748_v8  ;;  %v4049_v11 = vpop.f32.mrb[47].mxu0  ;;  %v3704_v8 = vld [vmem:[%s1031_s5] ss:$0 sm:$0xff] }
 0xff8   : > { %v2756_v12 = vpack.c.bf16 %v2755_v10, %v2754_v9 }
 0xffa   : > { %4053 = vmatmul.mubr.msk.bf16.vlgmr.msra.gmra.mrb[56].mxu1 %vm1404_vm1, %v2756_v12 }
 0xffb   : > { %3831 = vmatpush3.bf16.msra.mxu1 %v4261_v47  ;;  %v3722_v47 = vld [vmem:[%s1028_s24] ss:$0 sm:$0xff]  ;;  %s6002_s24 = sld [smem:[#allocation26_spill]] }
 0xffc   : > { %3832 = vmatprep.subr.bf16.mxu1 %v4262_v48 }
 0xfff   : > { %3833 = vmatpush3.bf16.msra.mxu1 %v4263_v49 }
0x1000   : > { %3834 = vmatprep.subr.bf16.mxu1 %v4264_v50 }
0x1001   : > { %s3754_s25 = sshll.u32 %s6002_s24, 8 }
0x1003   : > { %3835 = vmatpush3.bf16.msra.mxu1 %v4265_v3 }
0x1004   : > { %3836 = vmatprep.subr.bf16.mxu1 %v4266_v51 }
0x1007   : > { %3837 = vmatpush3.bf16.msra.mxu1 %v4267_v53 }
0x1008   : > { %3838 = vmatprep.subr.bf16.mxu1 %v4268_v54 }
0x100b   : > { %3839 = vmatpush3.bf16.msra.mxu1 %v4269_v52 }
0x100c   : > { %3840 = vmatprep.subr.bf16.mxu1 %v4270_v44 }
0x10cd   : > { %v2803_v14 = vpop.f32.mrb[56].mxu1 }
0x10ce   : > { %v2810_v17 = vadd.f32 %v2803_v14, %v2633_v58  ;;  %v4054_v18 = vpop.f32.mrb[57].mxu1 }
0x10cf   : > { %v2806_v19 = vpop.f32.mrb[58].mxu1 }
0x10d0   : > { %v2819_v20 = vadd.f32 %v3703_v15, %v2810_v17  ;;  %v2811_v41 = vadd.f32 %v2806_v19, %v2634_v61  ;;  %v4055_v21 = vpop.f32.mrb[59].mxu1 }
0x10d1   : > { %v4272_v21 = vld [vmem:[%s5350_s11 + $0x70] sm:$0xff]  }
0x10d2   : > { %v2820_v22 = vadd.f32 %v3703_v15, %v2811_v41  ;;  %v5678_v24 = vadd.f32 %v4348_v23, %v2819_v20  ;;  %v3705_v15 = vld [vmem:[%s1034_s8] ss:$0 sm:$0xff]  ;;  %v4271_v41 = vld [vmem:[%s5350_s11 + $0x28] sm:$0xff]   ;;  %v4274_v23 = vld [vmem:[%s5350_s11 + $0x78] sm:$0xff]  }
0x10d3   : > { %3841 = vmatpush3.bf16.msra.mxu1 %v4271_v41 }
0x10d4   : > { %2825 = vadd.xlane.f32.xlu1 %v5678_v24  ;;  %v5682_v26 = vadd.f32 %v4349_v25, %v2820_v22  ;;  %v2832_v28 = vmul.f32 %v5678_v24, %v5678_v24  ;;  %v4273_v22 = vld [vmem:[%s5350_s11 + $0x30] sm:$0xff]   ;;  %3842 = vmatprep.subr.bf16.mxu1 %v4272_v21  ;;  %v2887_v25 = vlaneseq }
0x10d6   : > { %v2833_v27 = vmul.f32 %v5682_v26, %v5682_v26 }
0x10d7   : > { %3843 = vmatpush3.bf16.msra.mxu1 %v4273_v22 }
0x10d8   : > { %2827 = vadd.xlane.f32.xlu1 %v5682_v26  ;;  %2836 = vadd.xlane.f32.xlu0 %v2833_v27 }
0x10d9   : > { %3844 = vmatprep.subr.bf16.mxu1 %v4274_v23 }
0x10dc   : > { %2834 = vadd.xlane.f32.xlu1 %v2832_v28  ;;  %v2885_v28 = vld [vmem:[%s5328_s19] sm:$0x3] }
0x1161   : > { %v2826_v55 = vpop.xlane.xlu1 %2825 }
0x1162   : > { %v2830_v57 = vmul.f32 0.0078125, %v2826_v55 }
0x1164   : > { %v2840_v62 = vmul.f32 %v2830_v57, %v2830_v57  ;;  %v2844_v9 = vsub.f32 %v5678_v24, %v2830_v57  ;;  %v4275_v24 = vld [vmem:[%s5350_s11 + $0x38] sm:$0xff]  }
0x1165   : > { %v2828_v56 = vpop.xlane.xlu1 %2827  ;;  %v2837_v5 = vpop.xlane.xlu0 %2836  ;;  %3845 = vmatpush3.bf16.msra.mxu1 %v4275_v24 }
0x1166   : > { %v2831_v58 = vmul.f32 0.0078125, %v2828_v56  ;;  %v2839_v60 = vmul.f32 0.0078125, %v2837_v5 }
0x1168   : > { %v2841_v59 = vmul.f32 %v2831_v58, %v2831_v58  ;;  %v2845_v6 = vsub.f32 %v5682_v26, %v2831_v58  ;;  %v2888_v26 = vshrl.u32 %v2887_v25, 7 }
0x1169   : > { %v2835_v61 = vpop.xlane.xlu1 %2834 }
0x116a   : > { %v2843_v63 = vsub.f32 %v2839_v60, %v2841_v59  ;;  %v2838_v0 = vmul.f32 0.0078125, %v2835_v61  ;;  %v2889_v27 = vsub.s32 0, %v2888_v26  ;;  %v2893_v29 = vsub.s32 1, %v2888_v26 }
0x116c   : > { %v2847_v1 = vadd.f32 1e-05, %v2843_v63  ;;  %v2842_v2 = vsub.f32 %v2838_v0, %v2840_v62  ;;  %v2890_v30 = vrot.slane %v2885_v28, %v2889_v27  ;;  %v2894_v31 = vrot.slane %v2885_v28, %v2893_v29 }
0x116e   : > { %4340 = vrsqrt.f32 %v2847_v1  ;;  %v2846_v4 = vadd.f32 1e-05, %v2842_v2 }
0x1170   : > { %4342 = vrsqrt.f32 %v2846_v4 }
0x1178   : > { %v4341_v7 = vpop.eup %4340 }
0x1179   : > { %v2851_v10 = vmul.f32 %v4341_v7, %v2845_v6 }
0x117a   : > { %v4343_v11 = vpop.eup %4342 }
0x117b   : > { %v2850_v12 = vmul.f32 %v4343_v11, %v2844_v9  ;;  %v2859_v14 = vmul.f32 %v3704_v8, %v2851_v10  ;;  %v3739_v10 = vld [vmem:[%s1037_s10] ss:$0 sm:$0xff]  ;;  %s6006_s10 = sld [smem:[#allocation61_spill]] }
0x117d   : > { %v2858_v17 = vmul.f32 %v3704_v8, %v2850_v12  ;;  %v2867_v19 = vadd.f32 %v3705_v15, %v2859_v14  ;;  %v3740_v12 = vld [vmem:[%s1040_s17] ss:$0 sm:$0xff]  ;;  %s4560_s17 = scalar_lea.vmem %s5757_s0, 256 }
0x117e   : > { %p4561_p0 = scmp.ne.s32.totalorder %s5757_s0, %s4560_s17  ;;  %p4568_p3 = scmp.lt.s32.totalorder %s4566_s16, %s4560_s17 }
0x117f   : > { %v2866_v18 = vadd.f32 %v3705_v15, %v2858_v17 }
0x1180   : > { %p4562_p7 = pnand %p4561_p0, %p6007_p5  ;;  %p4569_p12 = por %p4568_p3, %p4567_p9 }
0x1181   : > { %v2868_v20 = vpack.c.bf16 %v2867_v19, %v2866_v18  ;;  %s5755_s3 = scalar_lea.hbm %s6006_s10, %s3754_s25 }
0x1182   : > { %p4563_p10 = pneg %p4562_p7 }
0x1183   : > { %3010 = vmatmul.mubr.bf16.vlgmr.msra.gmra.mrb[48].mxu0 %v2868_v20 }
0x1184   : > { %p4570_p13 = pnand %p4569_p12, %p4563_p10 }
0x1256   : > { %v3011_v32 = vpop.f32.mrb[48].mxu0 }
0x1257   : > { %v3012_v33 = vadd.f32 %v3011_v32, %v2890_v30  ;;  %v3013_v13 = vpop.f32.mrb[49].mxu0 }
0x1258   : > { %v3014_v34 = vadd.f32 %v3013_v13, %v2894_v31  ;;  %v3015_v35 = vpop.f32.mrb[50].mxu0 }
0x1259   : > { %v3016_v36 = vadd.f32 %v3015_v35, %v2890_v30  ;;  %v3017_v16 = vpop.f32.mrb[51].mxu0  ;;  %v3020_v38 = vmax.f32 %v3012_v33, 0.0 }
0x125a   : > { %v3018_v37 = vadd.f32 %v3017_v16, %v2894_v31  ;;  %v3021_v40 = vmax.f32 %v3014_v34, 0.0 }
0x125b   : > { %v3022_v39 = vmax.f32 %v3016_v36, 0.0 }
0x125c   : > { %v3023_v42 = vmax.f32 %v3018_v37, 0.0 }
0x125d   : > { %v3024_v43 = vpack.c.bf16 %v3022_v39, %v3020_v38 }
0x125e   : > { %v3025_v45 = vpack.c.bf16 %v3023_v42, %v3021_v40 }
0x1260   : > { %3193 = vmatprep.mubr.bf16.mxu1 %v3025_v45 }
0x1261   : > { %3194 = vmatmul.mubr.bf16.vlgmr.msra.gmra.mrb[60].mxu1 %v3024_v43 }
0x1334   : > { %v3846_v46 = vpop.f32.mrb[60].mxu1 }
0x1335   : > { %v3847_v48 = vpop.f32.mrb[61].mxu1 }
0x1336   : > { %v3848_v49 = vadd.f32 %v3847_v48, %v3846_v46  ;;  %v3849_v50 = vpop.f32.mrb[62].mxu1 }
0x1337   : > { %v3850_v3 = vpop.f32.mrb[63].mxu1 }
0x1338   : > { %v3196_v51 = vadd.f32 %v3848_v49, %v3722_v47  ;;  %v3851_v53 = vadd.f32 %v3850_v3, %v3849_v50 }
0x133a   : > { %v3199_v54 = vadd.f32 %v3851_v53, %v3722_v47  ;;  %v3202_v52 = vadd.f32 %v3196_v51, %v2866_v18 }
0x133c   : > { %3206 = vadd.xlane.f32.xlu1 %v3202_v52  ;;  %v3203_v44 = vadd.f32 %v3199_v54, %v2867_v19  ;;  %v3212_v55 = vmul.f32 %v3202_v52, %v3202_v52 }
0x133e   : > { %v3213_v56 = vmul.f32 %v3203_v44, %v3203_v44 }
0x1340   : > { %3208 = vadd.xlane.f32.xlu1 %v3203_v44 }
0x1344   : > { %3214 = vadd.xlane.f32.xlu1 %v3212_v55 }
0x1348   : > { %3216 = vadd.xlane.f32.xlu1 %v3213_v56 }
0x13c9   : > { %v3207_v5 = vpop.xlane.xlu1 %3206 }
0x13ca   : > { %v3210_v58 = vmul.f32 0.0078125, %v3207_v5 }
0x13cc   : > { %v3220_v60 = vmul.f32 %v3210_v58, %v3210_v58  ;;  %v3224_v8 = vsub.f32 %v3202_v52, %v3210_v58 }
0x13cd   : > { %v3209_v57 = vpop.xlane.xlu1 %3208 }
0x13ce   : > { %v3211_v61 = vmul.f32 0.0078125, %v3209_v57 }
0x13d0   : > { %v3221_v1 = vmul.f32 %v3211_v61, %v3211_v61  ;;  %v3225_v14 = vsub.f32 %v3203_v44, %v3211_v61 }
0x13d1   : > { %v3215_v59 = vpop.xlane.xlu1 %3214 }
0x13d2   : > { %v3218_v62 = vmul.f32 0.0078125, %v3215_v59 }
0x13d4   : > { %v3222_v63 = vsub.f32 %v3218_v62, %v3220_v60 }
0x13d5   : > { %v3217_v0 = vpop.xlane.xlu1 %3216 }
0x13d6   : > { %v3226_v2 = vadd.f32 1e-05, %v3222_v63  ;;  %v3219_v4 = vmul.f32 0.0078125, %v3217_v0 }
0x13d8   : > { %4344 = vrsqrt.f32 %v3226_v2  ;;  %v3223_v6 = vsub.f32 %v3219_v4, %v3221_v1 }
0x13da   : > { %v3227_v7 = vadd.f32 1e-05, %v3223_v6 }
0x13dc   : > { %4346 = vrsqrt.f32 %v3227_v7 }
0x13e2   : > { %v4345_v9 = vpop.eup %4344 }
0x13e3   : > { %v3230_v11 = vmul.f32 %v4345_v9, %v3224_v8 }
0x13e5   : > { %v3238_v15 = vmul.f32 %v3739_v10, %v3230_v11 }
0x13e6   : > { %v4347_v17 = vpop.eup %4346 }
0x13e7   : > { %v3231_v18 = vmul.f32 %v4347_v17, %v3225_v14  ;;  %v3246_v19 = vadd.f32 %v3740_v12, %v3238_v15 }
0x13e9   : > { %v3239_v20 = vmul.f32 %v3739_v10, %v3231_v18  ;;  %3248 = vst [vmem:[%s5354_s29] sm:$0xff] %v3246_v19 }
0x13eb   : > { %v3247_v41 = vadd.f32 %v3740_v12, %v3239_v20 }
0x13ed   : > { %3249 = vst [vmem:[%s5354_s29 + $0x8] sm:$0xff] %v3247_v41 }
0x13ee   : > { %4573 = shalt.err (!%p4570_p13)
}
0x13ef   : > { %s4574_s29 = scalar_lea.hbm %s5755_s3, 256  ;;  %s4578_s9 = scalar_lea.hbm %s6006_s10, 512 }
0x13f0   : > { %p4575_p8 = scmp.ne.s32.totalorder %s5755_s3, %s4574_s29  ;;  %p4579_p6 = scmp.lt.u32.totalorder %s5755_s3, %s6006_s10 }
0x13f1   : > { %p4580_p4 = scmp.lt.u32.totalorder %s4578_s9, %s4574_s29  ;;  %p4582_p0 = scmp.lt.u32.totalorder %s4574_s29, %s5755_s3 }
0x13f2   : > { %p4576_p11 = pnand %p4575_p8, %p6007_p5 }
0x13f3   : > { %p4581_p1 = por %p4580_p4, %p4579_p6 }
0x13f4   : > { %p4577_p2 = pneg %p4576_p11 }
0x13f5   : > { %p4583_p7 = por %p4582_p0, %p4581_p1 }
0x13f7   : > { %p4584_p10 = pnand %p4583_p7, %p4577_p2 }
0x13f9   : > { %4587 = shalt.err (!%p4584_p10)
}
0x13fa   : > { %s4718_s6 = smov 128   ;;  %s4719_s27 = smov 8  }
0x13fb   : > { %4070 = dma.vmem_to_hbm [thread:$0]  (%p6007_p5), %s5757_s0, 256, %s5755_s3, %s3251_s30, %s4718_s6, %s4718_s6, %s4719_s27  }
0x13fc PF: > { %s6008_s5 = sld [smem:[#allocation29_spill]]  ;;  %s6009_s8 = sld [smem:[#allocation22_spill]] }
0x13fd   : > { %s6010_s19 = sld [smem:[#allocation38_spill]] }
0x1402   : > { %p4099_p9 = scmp.ge.s32.totalorder %s6008_s5, 2  ;;  %s3279_s24 = sand.u32 1, %s6009_s8  }
0x1403   : > { %p6011_p3 = scmp.ne.s32.totalorder %s6010_s19, 0  ;;  %s3280_s11 = scalar_lea.sflag [#allocation4], %s3279_s24 }
0x1405   : > { %p4095_p12 = pnand %p4099_p9, %p6011_p3 }
0x1407   : > { %4649 = dma.done.wait (!%p4095_p12), %s3280_s11, 256  }
0x1408   : > { %4651 = vsyncadd (!%p4095_p12), %s3280_s11, 4294967040  ;;  %s44_s3 = sadd.s32 1, %s6008_s5   ;;  %s6012_s0 = sld [smem:[#allocation20_spill]] }
0x1409   : > { %p41_p13 = scmp.ge.s32.totalorder %s44_s3, 6   ;;  %s6013_s30 = sld [smem:[#allocation21_spill]] }
0x140a   : > { %s6014_s20 = sld [smem:[#allocation31_spill]]  ;;  %s6015_s21 = sld [smem:[#allocation23_spill]] }
0x140b   : > { %s6016_s1 = sld [smem:[#allocation24_spill]]  ;;  %s6017_s22 = sld [smem:[#allocation37_spill]] }
0x140c   : > { %s6018_s2 = sld [smem:[#allocation27_spill]]  ;;  %s6019_s23 = sld [smem:[#allocation28_spill]] }
0x140d   : > { %s6020_s24 = sld [smem:[#allocation30_spill]]  ;;  %s6021_s25 = sld [smem:[#allocation34_spill]] }
0x140e   :  { %43 = sbr.rel (!%p41_p13) target bundleno = 36 (0x24), region = 260 }
0x1415   :  { %3285 = vsyncpa [#allocation3], 1 }
0x1416   :  { %3287 = vsyncpa [#allocation3 + $0x1], 1 }
0x1417   :  { %3288 = vsyncpa [#allocation6], 1 }
0x1418   :  { %3290 = vsyncpa [#allocation6 + $0x1], 1 }
0x1419   :  { %3291 = vsyncpa [#allocation9], 1 }
0x141a   :  { %3293 = vsyncpa [#allocation9 + $0x1], 1 }
0x141b   :  { %3294 = vsyncpa [#allocation12], 1 }
0x141c   :  { %3296 = vsyncpa [#allocation12 + $0x1], 1 }
0x141d   :  { %3297 = vsyncpa [#allocation4], 1 }
0x141e   :  { %3299 = vsyncpa [#allocation4 + $0x1], 1 }

</bundles_post_ra>
